<compile_context>
chip_gen: v6e
topology: v6e:2x2x1
jax: 0.10.0
libtpu: 0.0.40
codegen_flags: <defaults>
</compile_context>

<pallas_src>
import numpy as np
import jax
import jax.numpy as jnp
from jax.experimental import pallas as pl
from jax.experimental.pallas import tpu as pltpu

_EPS = 1e-5
_TAPS = tuple((dy, dx) for dy in (-1, 0, 1) for dx in (-1, 0, 1))


# ---------------------------------------------------------------------------
# Glue: reverse-bilinear scatter weights S[b, n, p] (align_corners=True)
# ---------------------------------------------------------------------------
def build_scatter_weights(xy, H, W):
    """S[b, n, p] = bilinear splat weight of point n onto flat pixel p (p = y*W + x)."""
    B, N, _ = xy.shape
    px = (xy[..., 0] + 1.0) * 0.5 * (W - 1)
    py = (xy[..., 1] + 1.0) * 0.5 * (H - 1)
    x0 = jnp.floor(px); y0 = jnp.floor(py)
    x1 = x0 + 1.0;      y1 = y0 + 1.0
    wx1 = px - x0; wx0 = 1.0 - wx1
    wy1 = py - y0; wy0 = 1.0 - wy1
    bb = jnp.broadcast_to(jnp.arange(B, dtype=jnp.int32)[:, None], (B, N))
    nn = jnp.broadcast_to(jnp.arange(N, dtype=jnp.int32)[None, :], (B, N))
    S = jnp.zeros((B, N, H * W), jnp.float32)
    for xi, yi, w in ((x0, y0, wx0 * wy0), (x1, y0, wx1 * wy0),
                      (x0, y1, wx0 * wy1), (x1, y1, wx1 * wy1)):
        valid = ((xi >= 0) & (xi <= W - 1) & (yi >= 0) & (yi <= H - 1)).astype(jnp.float32)
        pix = (jnp.clip(yi, 0, H - 1).astype(jnp.int32) * W
               + jnp.clip(xi, 0, W - 1).astype(jnp.int32))
        S = S.at[bb, nn, pix].add(w * valid)
    return S


def build_col_masks(H, W):
    """Two horizontal-wrap masks: row 0 valid for dx=-1 (x>=1), row 1 for dx=+1 (x<=W-2)."""
    xs = np.tile(np.arange(W), H)
    m = np.zeros((2, H * W), np.float32)
    m[0] = (xs >= 1).astype(np.float32)
    m[1] = (xs <= W - 2).astype(np.float32)
    return jnp.asarray(m)


# ---------------------------------------------------------------------------
# Parameters (deterministic, synthetic)
# ---------------------------------------------------------------------------
def init_params(key, ic, pc, outplanes):
    rc = ic // 4
    cin = ic + pc
    ks = jax.random.split(key, 16)

    def rnd(k, shape, s=0.1):
        return (s * jax.random.normal(k, shape)).astype(jnp.float32)

    p = dict(
        w1=rnd(ks[0], (rc, ic)), b1=rnd(ks[1], (rc,)),       # fc1
        w2=rnd(ks[2], (rc, pc)), b2=rnd(ks[3], (rc,)),       # fc2
        w3=rnd(ks[4], (1, rc)), b3=rnd(ks[5], (1,)),         # fc3
        w4=rnd(ks[6], (rc, 3)), b4=rnd(ks[7], (rc,)),        # fc4
        wc=rnd(ks[8], (pc, pc)), bc=rnd(ks[9], (pc,)),       # Conv1d(pc,pc,1) (k=1 squeezed)
        gp=1.0 + rnd(ks[10], (pc,)), bp=rnd(ks[11], (pc,)),  # BatchNorm1d affine
        mp=rnd(ks[12], (pc,)), vp=1.0 + jnp.abs(rnd(ks[13], (pc,))),  # BN1d running stats
        wconv=rnd(ks[14], (outplanes, cin, 3, 3)),           # conv3x3 (no bias)
        g2=1.0 + rnd(ks[15], (outplanes,)),                  # BatchNorm2d gamma
    )
    ks2 = jax.random.split(jax.random.fold_in(key, 1), 3)
    p['bt2'] = rnd(ks2[0], (outplanes,))
    p['m2'] = rnd(ks2[1], (outplanes,))
    p['v2'] = 1.0 + jnp.abs(rnd(ks2[2], (outplanes,)))
    return p


# ---------------------------------------------------------------------------
# Pallas forward pass (single fused kernel, whole batch per grid step)
# ---------------------------------------------------------------------------
def fusion_cross_conv_gate_pallas(params, point_features, img_features, li_xy_cor,
                                  image, li_xyz):
    B, IC, N = img_features.shape
    PC = point_features.shape[1]
    _, _, H, W = image.shape
    HW = H * W
    Cin = PC + IC
    Cout = params['wconv'].shape[0]
    rc = params['w1'].shape[0]
    rcp = ((rc + 7) // 8) * 8                     # pad each gate block to a sublane multiple
    Kg = IC + PC + 3
    PAD = ((W + 1 + 127) // 128) * 128            # lane pad >= max conv shift, 128-aligned
    f32 = jnp.float32
    BT = B                                        # fold whole (small) batch into one grid step

    # ---- gate input [img ; point ; xyz], lane axis = B*N (batch folded) ----
    xyz_cn = jnp.transpose(li_xyz.reshape(B, N, 3), (0, 2, 1))
    cat_cn = jnp.concatenate([img_features, point_features, xyz_cn], axis=1).astype(f32)
    cat_flat = jnp.transpose(cat_cn, (1, 0, 2)).reshape(Kg, B * N)           # (Kg, B*N)

    # ---- merged block-structured gate weight / bias (rows padded to rcp) ----
    Wg = jnp.zeros((3 * rcp, Kg), f32)
    Wg = Wg.at[0:rc, 0:IC].set(params['w1'])
    Wg = Wg.at[rcp:rcp + rc, IC:IC + PC].set(params['w2'])
    Wg = Wg.at[2 * rcp:2 * rcp + rc, IC + PC:Kg].set(params['w4'])
    bg = jnp.zeros((3 * rcp, 1), f32)
    bg = bg.at[0:rc, 0].set(params['b1'])
    bg = bg.at[rcp:rcp + rc, 0].set(params['b2'])
    bg = bg.at[2 * rcp:2 * rcp + rc, 0].set(params['b4'])
    w3c = params['w3'].reshape(rc, 1).astype(f32)
    b3r = params['b3'].reshape(1, 1).astype(f32)

    # ---- fold BN1d (inference) into Conv1d(pc, pc, 1) ----
    s1 = params['gp'] * jax.lax.rsqrt(params['vp'] + _EPS)
    wc_f = (params['wc'] * s1[:, None]).astype(f32)
    bc_f = ((params['bc'] - params['mp']) * s1 + params['bp']).reshape(PC, 1).astype(f32)

    # ---- fold BN2d (inference) into conv3x3, flatten to (Cout, 9*Cin), bf16 ----
    s2 = params['g2'] * jax.lax.rsqrt(params['v2'] + _EPS)
    wconv_f = params['wconv'] * s2[:, None, None, None]                      # (Cout,Cin,3,3)
    Wc2 = jnp.transpose(wconv_f, (0, 2, 3, 1)).reshape(Cout, 9 * Cin).astype(jnp.bfloat16)
    bconv = (params['bt2'] - params['m2'] * s2).reshape(Cout, 1).astype(f32)

    # ---- reverse-bilinear scatter weights (B, N, HW) bf16; image bf16 ----
    S = build_scatter_weights(li_xy_cor, H, W).astype(jnp.bfloat16)
    img_flat = image.reshape(B, IC, HW).astype(jnp.bfloat16)
    masks = build_col_masks(H, W)                                            # (2, HW)

    def kernel(cat_ref, s_ref, img_ref, mask_ref, wg_ref, bg_ref, w3_ref, b3_ref,
               wc_ref, bc_ref, wconv_ref, bconv_ref, o_ref, wide_ref, patch_ref):
        # Zero only the two PAD borders, once. Scratch persists across grid steps;
        # the HW interior is fully overwritten every step and the pads never are.
        @pl.when(pl.program_id(0) == 0)
        def _():
            wide_ref[:, 0:PAD] = jnp.zeros((Cin, PAD), jnp.float32)
            wide_ref[:, PAD + HW:2 * PAD + HW] = jnp.zeros((Cin, PAD), jnp.float32)

        cat = cat_ref[...]                                                   # (Kg, BT*N)

        # --- P2IA attention gate: one block matmul across all BT*N columns ---
        z = jnp.dot(wg_ref[...], cat, preferred_element_type=jnp.float32) + bg_ref[...]
        ri = z[0:rc]
        rp = z[rcp:rcp + rc]
        rz = z[2 * rcp:2 * rcp + rc]
        h = jnp.tanh(rz * ri + rp)                                           # (rc, BT*N)
        att = jax.nn.sigmoid(
            jnp.sum(w3_ref[...] * h, axis=0, keepdims=True) + b3_ref[...])   # (1, BT*N)

        # --- Conv1d + folded BN1d + ReLU, then attention gate ---
        pt = cat[IC:IC + PC]                                                 # (PC, BT*N)
        pf = jnp.maximum(
            jnp.dot(wc_ref[...], pt, preferred_element_type=jnp.float32) + bc_ref[...],
            0.0)
        gated = (pf * att).astype(jnp.bfloat16)                              # (PC, BT*N)

        mask_l = mask_ref[0:1, :]                                            # dx = -1 valid
        mask_r = mask_ref[1:2, :]                                            # dx = +1 valid
        wconv = wconv_ref[...]                                               # (Cout, 9*Cin) bf16
        bconv_v = bconv_ref[...]                                             # (Cout, 1)

        for bb in range(BT):
            # reverse bilinear grid-sample == scatter, as one lane-dense matmul
            proj = jnp.dot(gated[:, bb * N:(bb + 1) * N], s_ref[bb],
                           preferred_element_type=jnp.float32)               # (PC, HW)
            wide_ref[0:PC, PAD:PAD + HW] = proj
            wide_ref[PC:PC + IC, PAD:PAD + HW] = img_ref[bb].astype(jnp.float32)

            # im2col: 9 shifted lane-slices. Vertical OOB taps land in the zero pads;
            # only the two horizontal wrap-around columns need masking.
            for t, (dy, dx) in enumerate(_TAPS):
                d = dy * W + dx
                shifted = wide_ref[:, PAD + d:PAD + d + HW]                   # (Cin, HW)
                if dx == -1:
                    shifted = shifted * mask_l
                elif dx == 1:
                    shifted = shifted * mask_r
                patch_ref[t * Cin:(t + 1) * Cin, :] = shifted.astype(jnp.bfloat16)

            # 3x3 conv (BN2d folded) as a single K=9*Cin bf16 matmul + ReLU
            out = jnp.dot(wconv, patch_ref[...],
                          preferred_element_type=jnp.float32) + bconv_v
            o_ref[bb] = jnp.maximum(out, 0.0)                                 # (Cout, HW)

    def shared(arr):
        n = arr.ndim
        return pl.BlockSpec(arr.shape, lambda g, _n=n: (0,) * _n)

    in_specs = [
        pl.BlockSpec((Kg, BT * N), lambda g: (0, g)),
        pl.BlockSpec((BT, N, HW), lambda g: (g, 0, 0)),
        pl.BlockSpec((BT, IC, HW), lambda g: (g, 0, 0)),
        shared(masks), shared(Wg), shared(bg), shared(w3c), shared(b3r),
        shared(wc_f), shared(bc_f), shared(Wc2), shared(bconv),
    ]
    out_specs = pl.BlockSpec((BT, Cout, HW), lambda g: (g, 0, 0))

    # Advisory cost estimate for XLA scheduling around the custom call.
    flops = (2 * (3 * rcp) * Kg * B * N + 2 * PC * PC * B * N
             + 2 * PC * N * HW * B + 2 * Cout * 9 * Cin * HW * B)
    bytes_accessed = (cat_flat.size * 4 + S.size * 2 + img_flat.size * 2
                      + masks.size * 4 + Wc2.size * 2 + B * Cout * HW * 4)
    cost = pl.CostEstimate(flops=flops, transcendentals=2 * B * N * (rc + 1),
                           bytes_accessed=bytes_accessed)

    # Explicit (v7x-safe, 64 MiB physical) VMEM budget with headroom.
    block_bytes = (Kg * BT * N * 4 + BT * N * HW * 2 + BT * IC * HW * 2
                   + BT * Cout * HW * 4)
    scratch_bytes = Cin * (HW + 2 * PAD) * 4 + 9 * Cin * HW * 2
    vmem_limit = int(min(max(4 * block_bytes + 2 * scratch_bytes, 16 << 20), 48 << 20))

    out = pl.pallas_call(
        kernel,
        out_shape=jax.ShapeDtypeStruct((B, Cout, HW), jnp.float32),
        grid=(B // BT,),
        in_specs=in_specs,
        out_specs=out_specs,
        scratch_shapes=[pltpu.VMEM((Cin, HW + 2 * PAD), jnp.float32),
                        pltpu.VMEM((9 * Cin, HW), jnp.bfloat16)],
        compiler_params=pltpu.CompilerParams(
            dimension_semantics=("arbitrary",),   # serial grid => pad-init-once is safe
            vmem_limit_bytes=vmem_limit),
        cost_estimate=cost,
    )(cat_flat, S, img_flat, masks, Wg, bg, w3c, b3r, wc_f, bc_f, Wc2, bconv)

    return out.reshape(B, Cout, H, W)                                         # NCHW


# ---------------------------------------------------------------------------
# Plain-JAX reference (for correctness check)
# ---------------------------------------------------------------------------
def fusion_cross_conv_gate_reference(params, point_features, img_features, li_xy_cor,
                                     image, li_xyz):
    B, IC, N = img_features.shape
    PC = point_features.shape[1]
    _, _, H, W = image.shape
    hp = jax.lax.Precision.HIGHEST

    img_f = jnp.transpose(img_features, (0, 2, 1)).reshape(-1, IC)
    pt_f = jnp.transpose(point_features, (0, 2, 1)).reshape(-1, PC)
    ri = img_f @ params['w1'].T + params['b1']
    rp = pt_f @ params['w2'].T + params['b2']
    rz = li_xyz @ params['w4'].T + params['b4']
    att = jax.nn.sigmoid(jnp.tanh(rz * ri + rp) @ params['w3'].T + params['b3'])
    att = att.reshape(B, 1, N)

    pf = jnp.einsum('oc,bcn->bon', params['wc'], point_features,
                    precision=hp) + params['bc'][None, :, None]
    pf = ((pf - params['mp'][None, :, None])
          * jax.lax.rsqrt(params['vp'][None, :, None] + _EPS)
          * params['gp'][None, :, None] + params['bp'][None, :, None])
    pf = jnp.maximum(pf, 0.0)
    gated = pf * att                                          # (B, PC, N)

    S = build_scatter_weights(li_xy_cor, H, W)                # (B, N, HW)
    proj = jnp.einsum('bcn,bnp->bcp', gated, S, precision=hp).reshape(B, PC, H, W)

    fusion = jnp.concatenate([proj, image], axis=1)
    out = jax.lax.conv_general_dilated(
        fusion, params['wconv'], window_strides=(1, 1), padding=((1, 1), (1, 1)),
        dimension_numbers=('NCHW', 'OIHW', 'NCHW'), precision=hp)
    out = ((out - params['m2'][None, :, None, None])
           * jax.lax.rsqrt(params['v2'][None, :, None, None] + _EPS)
           * params['g2'][None, :, None, None] + params['bt2'][None, :, None, None])
    return jnp.maximum(out, 0.0)


if __name__ == "__main__":
    B, IC, PC, OUT = 2, 8, 8, 16          # inplanes_I, inplanes_P, outplanes
    N, H, W = 32, 16, 16                  # points per cloud, image feature-map size

    key = jax.random.PRNGKey(0)
    kp, k1, k2, k3, k4, k5 = jax.random.split(key, 6)
    params = init_params(kp, IC, PC, OUT)

    point_features = jax.random.normal(k1, (B, PC, N), jnp.float32)     # (B, pc, N)
    img_features = jax.random.normal(k2, (B, IC, N), jnp.float32)       # (B, ic, N)
    li_xy_cor = jax.random.uniform(k3, (B, N, 2), jnp.float32, minval=-1.0, maxval=1.0)
    image = jax.random.normal(k4, (B, IC, H, W), jnp.float32)           # NCHW
    li_xyz = jax.random.normal(k5, (B * N, 3), jnp.float32)             # flattened, batch-major

    out = fusion_cross_conv_gate_pallas(params, point_features, img_features,
                                        li_xy_cor, image, li_xyz)
    out = jax.block_until_ready(out)

    ref = jax.block_until_ready(
        fusion_cross_conv_gate_reference(params, point_features, img_features,
                                         li_xy_cor, image, li_xyz))

    assert out.shape == (B, OUT, H, W), out.shape
    np.testing.assert_allclose(np.asarray(out), np.asarray(ref), atol=5e-2, rtol=5e-2)
    print("KERNEL_OK")
</pallas_src>

<mosaic_0001>
module attributes {stable_mosaic.version = 11 : i64} {
  func.func @kernel(%arg0: i32, %arg1: memref<19x64xf32, #tpu.memory_space<vmem>>, %arg2: memref<2x32x256xbf16, #tpu.memory_space<vmem>>, %arg3: memref<2x8x256xbf16, #tpu.memory_space<vmem>>, %arg4: memref<2x256xf32, #tpu.memory_space<vmem>>, %arg5: memref<24x19xf32, #tpu.memory_space<vmem>>, %arg6: memref<24x1xf32, #tpu.memory_space<vmem>>, %arg7: memref<2x1xf32, #tpu.memory_space<vmem>>, %arg8: memref<1x1xf32, #tpu.memory_space<vmem>>, %arg9: memref<8x8xf32, #tpu.memory_space<vmem>>, %arg10: memref<8x1xf32, #tpu.memory_space<vmem>>, %arg11: memref<16x144xbf16, #tpu.memory_space<vmem>>, %arg12: memref<16x1xf32, #tpu.memory_space<vmem>>, %arg13: memref<2x16x256xf32, #tpu.memory_space<vmem>>, %arg14: memref<16x512xf32, #tpu.memory_space<vmem>>, %arg15: memref<144x256xbf16, #tpu.memory_space<vmem>>) attributes {dimension_semantics = [#tpu.dimension_semantics<arbitrary>], iteration_bounds = array<i64: 1>, scalar_prefetch = 0 : i64, scratch_operands = 2 : i64, tpu.core_type = #tpu.core_type<tc>, window_params = [{transform_indices = @transform_0, window_bounds = array<i64: 19, 64>}, {transform_indices = @transform_1, window_bounds = array<i64: 2, 32, 256>}, {transform_indices = @transform_2, window_bounds = array<i64: 2, 8, 256>}, {pipeline_mode = #tpu.pipeline_mode<synchronous>, transform_indices = @transform_3, window_bounds = array<i64: 2, 256>}, {pipeline_mode = #tpu.pipeline_mode<synchronous>, transform_indices = @transform_4, window_bounds = array<i64: 24, 19>}, {pipeline_mode = #tpu.pipeline_mode<synchronous>, transform_indices = @transform_5, window_bounds = array<i64: 24, 1>}, {pipeline_mode = #tpu.pipeline_mode<synchronous>, transform_indices = @transform_6, window_bounds = array<i64: 2, 1>}, {pipeline_mode = #tpu.pipeline_mode<synchronous>, transform_indices = @transform_7, window_bounds = array<i64: 1, 1>}, {pipeline_mode = #tpu.pipeline_mode<synchronous>, transform_indices = @transform_8, window_bounds = array<i64: 8, 8>}, {pipeline_mode = #tpu.pipeline_mode<synchronous>, transform_indices = @transform_9, window_bounds = array<i64: 8, 1>}, {pipeline_mode = #tpu.pipeline_mode<synchronous>, transform_indices = @transform_10, window_bounds = array<i64: 16, 144>}, {pipeline_mode = #tpu.pipeline_mode<synchronous>, transform_indices = @transform_11, window_bounds = array<i64: 16, 1>}, {transform_indices = @transform_12, window_bounds = array<i64: 2, 16, 256>}]} {
    %c0_i32 = arith.constant 0 : i32
    %0 = arith.cmpi eq, %arg0, %c0_i32 : i32
    %1 = arith.extui %0 : i1 to i32
    %c0_i32_0 = arith.constant 0 : i32
    %2 = arith.cmpi ne, %1, %c0_i32_0 : i32
    scf.if %2 {
      %cst_117 = arith.constant 0.000000e+00 : f32
      %157 = vector.broadcast %cst_117 : f32 to vector<16x128xf32>
      %c0_118 = arith.constant 0 : index
      %c0_119 = arith.constant 0 : index
      %158 = vector.load %arg14[%c0_118, %c0_119] : memref<16x512xf32, #tpu.memory_space<vmem>>, vector<16x128xf32>
      tpu.vector_store %arg14[%c0_118, %c0_119], %157 {strides = array<i32>} : memref<16x512xf32, #tpu.memory_space<vmem>>, vector<16x128xf32>,
      %cst_120 = arith.constant 0.000000e+00 : f32
      %159 = vector.broadcast %cst_120 : f32 to vector<16x128xf32>
      %c0_121 = arith.constant 0 : index
      %c384 = arith.constant 384 : index
      %160 = vector.load %arg14[%c0_121, %c384] : memref<16x512xf32, #tpu.memory_space<vmem>>, vector<16x128xf32>
      tpu.vector_store %arg14[%c0_121, %c384], %159 {strides = array<i32>} : memref<16x512xf32, #tpu.memory_space<vmem>>, vector<16x128xf32>,
    } else {
    }
    %c0 = arith.constant 0 : index
    %c0_1 = arith.constant 0 : index
    %3 = vector.load %arg1[%c0, %c0_1] : memref<19x64xf32, #tpu.memory_space<vmem>>, vector<19x64xf32>
    %c0_2 = arith.constant 0 : index
    %c0_3 = arith.constant 0 : index
    %4 = vector.load %arg5[%c0_2, %c0_3] : memref<24x19xf32, #tpu.memory_space<vmem>>, vector<24x19xf32>
    %cst = arith.constant dense<0.000000e+00> : vector<24x64xf32>
    %5 = tpu.matmul %4, %3, %cst {dimension_numbers = #tpu.dot_dimension_numbers<[1], [0], [0], [1], [0, 0, 1, 1], [], []>} : vector<24x19xf32>, vector<19x64xf32>, vector<24x64xf32> -> vector<24x64xf32>
    %c0_4 = arith.constant 0 : index
    %c0_5 = arith.constant 0 : index
    %6 = vector.load %arg6[%c0_4, %c0_5] : memref<24x1xf32, #tpu.memory_space<vmem>>, vector<24x1xf32>
    %7 = vector.broadcast %6 : vector<24x1xf32> to vector<24x64xf32>
    %8 = arith.addf %5, %7 : vector<24x64xf32>
    %9 = vector.extract_strided_slice %8 {offsets = [0, 0], sizes = [2, 64], strides = [1, 1]} : vector<24x64xf32> to vector<2x64xf32>
    %10 = vector.extract_strided_slice %8 {offsets = [8, 0], sizes = [2, 64], strides = [1, 1]} : vector<24x64xf32> to vector<2x64xf32>
    %11 = vector.extract_strided_slice %8 {offsets = [16, 0], sizes = [2, 64], strides = [1, 1]} : vector<24x64xf32> to vector<2x64xf32>
    %12 = arith.mulf %11, %9 : vector<2x64xf32>
    %13 = arith.addf %12, %10 : vector<2x64xf32>
    %14 = math.tanh %13 : vector<2x64xf32>
    %c0_6 = arith.constant 0 : index
    %c0_7 = arith.constant 0 : index
    %15 = vector.load %arg7[%c0_6, %c0_7] : memref<2x1xf32, #tpu.memory_space<vmem>>, vector<2x1xf32>
    %16 = vector.broadcast %15 : vector<2x1xf32> to vector<2x64xf32>
    %17 = arith.mulf %16, %14 : vector<2x64xf32>
    %cst_8 = arith.constant dense<0.000000e+00> : vector<64xf32>
    %18 = vector.multi_reduction <add>, %17, %cst_8 [0] : vector<2x64xf32> to vector<64xf32>
    %19 = vector.shape_cast %18 : vector<64xf32> to vector<1x64xf32>
    %c0_9 = arith.constant 0 : index
    %c0_10 = arith.constant 0 : index
    %20 = vector.load %arg8[%c0_9, %c0_10] : memref<1x1xf32, #tpu.memory_space<vmem>>, vector<1x1xf32>
    %21 = vector.broadcast %20 : vector<1x1xf32> to vector<1x64xf32>
    %22 = arith.addf %19, %21 : vector<1x64xf32>
    %23 = arith.negf %22 : vector<1x64xf32>
    %24 = math.exp %23 : vector<1x64xf32>
    %cst_11 = arith.constant 1.000000e+00 : f32
    %25 = vector.broadcast %cst_11 : f32 to vector<1x64xf32>
    %26 = arith.addf %25, %24 : vector<1x64xf32>
    %27 = arith.divf %25, %26 : vector<1x64xf32>
    %28 = vector.extract_strided_slice %3 {offsets = [8, 0], sizes = [8, 64], strides = [1, 1]} : vector<19x64xf32> to vector<8x64xf32>
    %c0_12 = arith.constant 0 : index
    %c0_13 = arith.constant 0 : index
    %29 = vector.load %arg9[%c0_12, %c0_13] : memref<8x8xf32, #tpu.memory_space<vmem>>, vector<8x8xf32>
    %cst_14 = arith.constant dense<0.000000e+00> : vector<8x64xf32>
    %30 = tpu.matmul %29, %28, %cst_14 {dimension_numbers = #tpu.dot_dimension_numbers<[1], [0], [0], [1], [0, 0, 1, 1], [], []>} : vector<8x8xf32>, vector<8x64xf32>, vector<8x64xf32> -> vector<8x64xf32>
    %c0_15 = arith.constant 0 : index
    %c0_16 = arith.constant 0 : index
    %31 = vector.load %arg10[%c0_15, %c0_16] : memref<8x1xf32, #tpu.memory_space<vmem>>, vector<8x1xf32>
    %32 = vector.broadcast %31 : vector<8x1xf32> to vector<8x64xf32>
    %33 = arith.addf %30, %32 : vector<8x64xf32>
    %cst_17 = arith.constant 0.000000e+00 : f32
    %34 = vector.broadcast %cst_17 : f32 to vector<8x64xf32>
    %35 = arith.maximumf %33, %34 : vector<8x64xf32>
    %36 = vector.broadcast %27 : vector<1x64xf32> to vector<8x64xf32>
    %37 = arith.mulf %35, %36 : vector<8x64xf32>
    %38 = arith.truncf %37 : vector<8x64xf32> to vector<8x64xbf16>
    %c0_18 = arith.constant 0 : index
    %c0_19 = arith.constant 0 : index
    %39 = vector.load %arg4[%c0_18, %c0_19] : memref<2x256xf32, #tpu.memory_space<vmem>>, vector<1x256xf32>
    %c1 = arith.constant 1 : index
    %c0_20 = arith.constant 0 : index
    %40 = vector.load %arg4[%c1, %c0_20] : memref<2x256xf32, #tpu.memory_space<vmem>>, vector<1x256xf32>
    %c0_21 = arith.constant 0 : index
    %c0_22 = arith.constant 0 : index
    %41 = vector.load %arg11[%c0_21, %c0_22] : memref<16x144xbf16, #tpu.memory_space<vmem>>, vector<16x144xbf16>
    %c0_23 = arith.constant 0 : index
    %c0_24 = arith.constant 0 : index
    %42 = vector.load %arg12[%c0_23, %c0_24] : memref<16x1xf32, #tpu.memory_space<vmem>>, vector<16x1xf32>
    %43 = vector.extract_strided_slice %38 {offsets = [0, 0], sizes = [8, 32], strides = [1, 1]} : vector<8x64xbf16> to vector<8x32xbf16>
    %c0_25 = arith.constant 0 : index
    %c0_26 = arith.constant 0 : index
    %c0_27 = arith.constant 0 : index
    %44 = vector.load %arg2[%c0_25, %c0_26, %c0_27] : memref<2x32x256xbf16, #tpu.memory_space<vmem>>, vector<1x32x256xbf16>
    %45 = vector.shape_cast %44 : vector<1x32x256xbf16> to vector<32x256xbf16>
    %cst_28 = arith.constant dense<0.000000e+00> : vector<8x256xf32>
    %46 = tpu.matmul %43, %45, %cst_28 {dimension_numbers = #tpu.dot_dimension_numbers<[1], [0], [0], [1], [0, 0, 1, 1], [], []>} : vector<8x32xbf16>, vector<32x256xbf16>, vector<8x256xf32> -> vector<8x256xf32>
    %c0_29 = arith.constant 0 : index
    %c128 = arith.constant 128 : index
    %47 = vector.load %arg14[%c0_29, %c128] : memref<16x512xf32, #tpu.memory_space<vmem>>, vector<8x256xf32>
    tpu.vector_store %arg14[%c0_29, %c128], %46 {strides = array<i32>} : memref<16x512xf32, #tpu.memory_space<vmem>>, vector<8x256xf32>,
    %c0_30 = arith.constant 0 : index
    %c0_31 = arith.constant 0 : index
    %c0_32 = arith.constant 0 : index
    %48 = vector.load %arg3[%c0_30, %c0_31, %c0_32] : memref<2x8x256xbf16, #tpu.memory_space<vmem>>, vector<1x8x256xbf16>
    %49 = vector.shape_cast %48 : vector<1x8x256xbf16> to vector<8x256xbf16>
    %50 = arith.extf %49 : vector<8x256xbf16> to vector<8x256xf32>
    %c8 = arith.constant 8 : index
    %c128_33 = arith.constant 128 : index
    %51 = vector.load %arg14[%c8, %c128_33] : memref<16x512xf32, #tpu.memory_space<vmem>>, vector<8x256xf32>
    tpu.vector_store %arg14[%c8, %c128_33], %50 {strides = array<i32>} : memref<16x512xf32, #tpu.memory_space<vmem>>, vector<8x256xf32>,
    %c0_34 = arith.constant 0 : index
    %c111 = arith.constant 111 : index
    %52 = vector.load %arg14[%c0_34, %c111] : memref<16x512xf32, #tpu.memory_space<vmem>>, vector<16x256xf32>
    %53 = vector.broadcast %39 : vector<1x256xf32> to vector<16x256xf32>
    %54 = arith.mulf %52, %53 : vector<16x256xf32>
    %55 = arith.truncf %54 : vector<16x256xf32> to vector<16x256xbf16>
    %c0_35 = arith.constant 0 : index
    %c0_36 = arith.constant 0 : index
    %56 = vector.load %arg15[%c0_35, %c0_36] : memref<144x256xbf16, #tpu.memory_space<vmem>>, vector<16x256xbf16>
    tpu.vector_store %arg15[%c0_35, %c0_36], %55 {strides = array<i32>} : memref<144x256xbf16, #tpu.memory_space<vmem>>, vector<16x256xbf16>,
    %c0_37 = arith.constant 0 : index
    %c112 = arith.constant 112 : index
    %57 = vector.load %arg14[%c0_37, %c112] : memref<16x512xf32, #tpu.memory_space<vmem>>, vector<16x256xf32>
    %58 = arith.truncf %57 : vector<16x256xf32> to vector<16x256xbf16>
    %c16 = arith.constant 16 : index
    %c0_38 = arith.constant 0 : index
    %59 = vector.load %arg15[%c16, %c0_38] : memref<144x256xbf16, #tpu.memory_space<vmem>>, vector<16x256xbf16>
    tpu.vector_store %arg15[%c16, %c0_38], %58 {strides = array<i32>} : memref<144x256xbf16, #tpu.memory_space<vmem>>, vector<16x256xbf16>,
    %c0_39 = arith.constant 0 : index
    %c113 = arith.constant 113 : index
    %60 = vector.load %arg14[%c0_39, %c113] : memref<16x512xf32, #tpu.memory_space<vmem>>, vector<16x256xf32>
    %61 = vector.broadcast %40 : vector<1x256xf32> to vector<16x256xf32>
    %62 = arith.mulf %60, %61 : vector<16x256xf32>
    %63 = arith.truncf %62 : vector<16x256xf32> to vector<16x256xbf16>
    %c32 = arith.constant 32 : index
    %c0_40 = arith.constant 0 : index
    %64 = vector.load %arg15[%c32, %c0_40] : memref<144x256xbf16, #tpu.memory_space<vmem>>, vector<16x256xbf16>
    tpu.vector_store %arg15[%c32, %c0_40], %63 {strides = array<i32>} : memref<144x256xbf16, #tpu.memory_space<vmem>>, vector<16x256xbf16>,
    %c0_41 = arith.constant 0 : index
    %c127 = arith.constant 127 : index
    %65 = vector.load %arg14[%c0_41, %c127] : memref<16x512xf32, #tpu.memory_space<vmem>>, vector<16x256xf32>
    %66 = vector.broadcast %39 : vector<1x256xf32> to vector<16x256xf32>
    %67 = arith.mulf %65, %66 : vector<16x256xf32>
    %68 = arith.truncf %67 : vector<16x256xf32> to vector<16x256xbf16>
    %c48 = arith.constant 48 : index
    %c0_42 = arith.constant 0 : index
    %69 = vector.load %arg15[%c48, %c0_42] : memref<144x256xbf16, #tpu.memory_space<vmem>>, vector<16x256xbf16>
    tpu.vector_store %arg15[%c48, %c0_42], %68 {strides = array<i32>} : memref<144x256xbf16, #tpu.memory_space<vmem>>, vector<16x256xbf16>,
    %c0_43 = arith.constant 0 : index
    %c128_44 = arith.constant 128 : index
    %70 = vector.load %arg14[%c0_43, %c128_44] : memref<16x512xf32, #tpu.memory_space<vmem>>, vector<16x256xf32>
    %71 = arith.truncf %70 : vector<16x256xf32> to vector<16x256xbf16>
    %c64 = arith.constant 64 : index
    %c0_45 = arith.constant 0 : index
    %72 = vector.load %arg15[%c64, %c0_45] : memref<144x256xbf16, #tpu.memory_space<vmem>>, vector<16x256xbf16>
    tpu.vector_store %arg15[%c64, %c0_45], %71 {strides = array<i32>} : memref<144x256xbf16, #tpu.memory_space<vmem>>, vector<16x256xbf16>,
    %c0_46 = arith.constant 0 : index
    %c129 = arith.constant 129 : index
    %73 = vector.load %arg14[%c0_46, %c129] : memref<16x512xf32, #tpu.memory_space<vmem>>, vector<16x256xf32>
    %74 = vector.broadcast %40 : vector<1x256xf32> to vector<16x256xf32>
    %75 = arith.mulf %73, %74 : vector<16x256xf32>
    %76 = arith.truncf %75 : vector<16x256xf32> to vector<16x256xbf16>
    %c80 = arith.constant 80 : index
    %c0_47 = arith.constant 0 : index
    %77 = vector.load %arg15[%c80, %c0_47] : memref<144x256xbf16, #tpu.memory_space<vmem>>, vector<16x256xbf16>
    tpu.vector_store %arg15[%c80, %c0_47], %76 {strides = array<i32>} : memref<144x256xbf16, #tpu.memory_space<vmem>>, vector<16x256xbf16>,
    %c0_48 = arith.constant 0 : index
    %c143 = arith.constant 143 : index
    %78 = vector.load %arg14[%c0_48, %c143] : memref<16x512xf32, #tpu.memory_space<vmem>>, vector<16x256xf32>
    %79 = vector.broadcast %39 : vector<1x256xf32> to vector<16x256xf32>
    %80 = arith.mulf %78, %79 : vector<16x256xf32>
    %81 = arith.truncf %80 : vector<16x256xf32> to vector<16x256xbf16>
    %c96 = arith.constant 96 : index
    %c0_49 = arith.constant 0 : index
    %82 = vector.load %arg15[%c96, %c0_49] : memref<144x256xbf16, #tpu.memory_space<vmem>>, vector<16x256xbf16>
    tpu.vector_store %arg15[%c96, %c0_49], %81 {strides = array<i32>} : memref<144x256xbf16, #tpu.memory_space<vmem>>, vector<16x256xbf16>,
    %c0_50 = arith.constant 0 : index
    %c144 = arith.constant 144 : index
    %83 = vector.load %arg14[%c0_50, %c144] : memref<16x512xf32, #tpu.memory_space<vmem>>, vector<16x256xf32>
    %84 = arith.truncf %83 : vector<16x256xf32> to vector<16x256xbf16>
    %c112_51 = arith.constant 112 : index
    %c0_52 = arith.constant 0 : index
    %85 = vector.load %arg15[%c112_51, %c0_52] : memref<144x256xbf16, #tpu.memory_space<vmem>>, vector<16x256xbf16>
    tpu.vector_store %arg15[%c112_51, %c0_52], %84 {strides = array<i32>} : memref<144x256xbf16, #tpu.memory_space<vmem>>, vector<16x256xbf16>,
    %c0_53 = arith.constant 0 : index
    %c145 = arith.constant 145 : index
    %86 = vector.load %arg14[%c0_53, %c145] : memref<16x512xf32, #tpu.memory_space<vmem>>, vector<16x256xf32>
    %87 = vector.broadcast %40 : vector<1x256xf32> to vector<16x256xf32>
    %88 = arith.mulf %86, %87 : vector<16x256xf32>
    %89 = arith.truncf %88 : vector<16x256xf32> to vector<16x256xbf16>
    %c128_54 = arith.constant 128 : index
    %c0_55 = arith.constant 0 : index
    %90 = vector.load %arg15[%c128_54, %c0_55] : memref<144x256xbf16, #tpu.memory_space<vmem>>, vector<16x256xbf16>
    tpu.vector_store %arg15[%c128_54, %c0_55], %89 {strides = array<i32>} : memref<144x256xbf16, #tpu.memory_space<vmem>>, vector<16x256xbf16>,
    %c0_56 = arith.constant 0 : index
    %c0_57 = arith.constant 0 : index
    %91 = vector.load %arg15[%c0_56, %c0_57] : memref<144x256xbf16, #tpu.memory_space<vmem>>, vector<144x256xbf16>
    %cst_58 = arith.constant dense<0.000000e+00> : vector<16x256xf32>
    %92 = tpu.matmul %41, %91, %cst_58 {dimension_numbers = #tpu.dot_dimension_numbers<[1], [0], [0], [1], [0, 0, 1, 1], [], []>} : vector<16x144xbf16>, vector<144x256xbf16>, vector<16x256xf32> -> vector<16x256xf32>
    %93 = vector.broadcast %42 : vector<16x1xf32> to vector<16x256xf32>
    %94 = arith.addf %92, %93 : vector<16x256xf32>
    %cst_59 = arith.constant 0.000000e+00 : f32
    %95 = vector.broadcast %cst_59 : f32 to vector<16x256xf32>
    %96 = arith.maximumf %94, %95 : vector<16x256xf32>
    %c0_60 = arith.constant 0 : index
    %c0_61 = arith.constant 0 : index
    %c0_62 = arith.constant 0 : index
    %97 = vector.load %arg13[%c0_60, %c0_61, %c0_62] : memref<2x16x256xf32, #tpu.memory_space<vmem>>, vector<1x16x256xf32>
    %98 = vector.shape_cast %97 : vector<1x16x256xf32> to vector<16x256xf32>
    %99 = vector.shape_cast %96 : vector<16x256xf32> to vector<1x16x256xf32>
    tpu.vector_store %arg13[%c0_60, %c0_61, %c0_62], %99 {strides = array<i32>} : memref<2x16x256xf32, #tpu.memory_space<vmem>>, vector<1x16x256xf32>,
    %100 = vector.extract_strided_slice %38 {offsets = [0, 32], sizes = [8, 32], strides = [1, 1]} : vector<8x64xbf16> to vector<8x32xbf16>
    %c1_63 = arith.constant 1 : index
    %c0_64 = arith.constant 0 : index
    %c0_65 = arith.constant 0 : index
    %101 = vector.load %arg2[%c1_63, %c0_64, %c0_65] : memref<2x32x256xbf16, #tpu.memory_space<vmem>>, vector<1x32x256xbf16>
    %102 = vector.shape_cast %101 : vector<1x32x256xbf16> to vector<32x256xbf16>
    %cst_66 = arith.constant dense<0.000000e+00> : vector<8x256xf32>
    %103 = tpu.matmul %100, %102, %cst_66 {dimension_numbers = #tpu.dot_dimension_numbers<[1], [0], [0], [1], [0, 0, 1, 1], [], []>} : vector<8x32xbf16>, vector<32x256xbf16>, vector<8x256xf32> -> vector<8x256xf32>
    %c0_67 = arith.constant 0 : index
    %c128_68 = arith.constant 128 : index
    %104 = vector.load %arg14[%c0_67, %c128_68] : memref<16x512xf32, #tpu.memory_space<vmem>>, vector<8x256xf32>
    tpu.vector_store %arg14[%c0_67, %c128_68], %103 {strides = array<i32>} : memref<16x512xf32, #tpu.memory_space<vmem>>, vector<8x256xf32>,
    %c1_69 = arith.constant 1 : index
    %c0_70 = arith.constant 0 : index
    %c0_71 = arith.constant 0 : index
    %105 = vector.load %arg3[%c1_69, %c0_70, %c0_71] : memref<2x8x256xbf16, #tpu.memory_space<vmem>>, vector<1x8x256xbf16>
    %106 = vector.shape_cast %105 : vector<1x8x256xbf16> to vector<8x256xbf16>
    %107 = arith.extf %106 : vector<8x256xbf16> to vector<8x256xf32>
    %c8_72 = arith.constant 8 : index
    %c128_73 = arith.constant 128 : index
    %108 = vector.load %arg14[%c8_72, %c128_73] : memref<16x512xf32, #tpu.memory_space<vmem>>, vector<8x256xf32>
    tpu.vector_store %arg14[%c8_72, %c128_73], %107 {strides = array<i32>} : memref<16x512xf32, #tpu.memory_space<vmem>>, vector<8x256xf32>,
    %c0_74 = arith.constant 0 : index
    %c111_75 = arith.constant 111 : index
    %109 = vector.load %arg14[%c0_74, %c111_75] : memref<16x512xf32, #tpu.memory_space<vmem>>, vector<16x256xf32>
    %110 = vector.broadcast %39 : vector<1x256xf32> to vector<16x256xf32>
    %111 = arith.mulf %109, %110 : vector<16x256xf32>
    %112 = arith.truncf %111 : vector<16x256xf32> to vector<16x256xbf16>
    %c0_76 = arith.constant 0 : index
    %c0_77 = arith.constant 0 : index
    %113 = vector.load %arg15[%c0_76, %c0_77] : memref<144x256xbf16, #tpu.memory_space<vmem>>, vector<16x256xbf16>
    tpu.vector_store %arg15[%c0_76, %c0_77], %112 {strides = array<i32>} : memref<144x256xbf16, #tpu.memory_space<vmem>>, vector<16x256xbf16>,
    %c0_78 = arith.constant 0 : index
    %c112_79 = arith.constant 112 : index
    %114 = vector.load %arg14[%c0_78, %c112_79] : memref<16x512xf32, #tpu.memory_space<vmem>>, vector<16x256xf32>
    %115 = arith.truncf %114 : vector<16x256xf32> to vector<16x256xbf16>
    %c16_80 = arith.constant 16 : index
    %c0_81 = arith.constant 0 : index
    %116 = vector.load %arg15[%c16_80, %c0_81] : memref<144x256xbf16, #tpu.memory_space<vmem>>, vector<16x256xbf16>
    tpu.vector_store %arg15[%c16_80, %c0_81], %115 {strides = array<i32>} : memref<144x256xbf16, #tpu.memory_space<vmem>>, vector<16x256xbf16>,
    %c0_82 = arith.constant 0 : index
    %c113_83 = arith.constant 113 : index
    %117 = vector.load %arg14[%c0_82, %c113_83] : memref<16x512xf32, #tpu.memory_space<vmem>>, vector<16x256xf32>
    %118 = vector.broadcast %40 : vector<1x256xf32> to vector<16x256xf32>
    %119 = arith.mulf %117, %118 : vector<16x256xf32>
    %120 = arith.truncf %119 : vector<16x256xf32> to vector<16x256xbf16>
    %c32_84 = arith.constant 32 : index
    %c0_85 = arith.constant 0 : index
    %121 = vector.load %arg15[%c32_84, %c0_85] : memref<144x256xbf16, #tpu.memory_space<vmem>>, vector<16x256xbf16>
    tpu.vector_store %arg15[%c32_84, %c0_85], %120 {strides = array<i32>} : memref<144x256xbf16, #tpu.memory_space<vmem>>, vector<16x256xbf16>,
    %c0_86 = arith.constant 0 : index
    %c127_87 = arith.constant 127 : index
    %122 = vector.load %arg14[%c0_86, %c127_87] : memref<16x512xf32, #tpu.memory_space<vmem>>, vector<16x256xf32>
    %123 = vector.broadcast %39 : vector<1x256xf32> to vector<16x256xf32>
    %124 = arith.mulf %122, %123 : vector<16x256xf32>
    %125 = arith.truncf %124 : vector<16x256xf32> to vector<16x256xbf16>
    %c48_88 = arith.constant 48 : index
    %c0_89 = arith.constant 0 : index
    %126 = vector.load %arg15[%c48_88, %c0_89] : memref<144x256xbf16, #tpu.memory_space<vmem>>, vector<16x256xbf16>
    tpu.vector_store %arg15[%c48_88, %c0_89], %125 {strides = array<i32>} : memref<144x256xbf16, #tpu.memory_space<vmem>>, vector<16x256xbf16>,
    %c0_90 = arith.constant 0 : index
    %c128_91 = arith.constant 128 : index
    %127 = vector.load %arg14[%c0_90, %c128_91] : memref<16x512xf32, #tpu.memory_space<vmem>>, vector<16x256xf32>
    %128 = arith.truncf %127 : vector<16x256xf32> to vector<16x256xbf16>
    %c64_92 = arith.constant 64 : index
    %c0_93 = arith.constant 0 : index
    %129 = vector.load %arg15[%c64_92, %c0_93] : memref<144x256xbf16, #tpu.memory_space<vmem>>, vector<16x256xbf16>
    tpu.vector_store %arg15[%c64_92, %c0_93], %128 {strides = array<i32>} : memref<144x256xbf16, #tpu.memory_space<vmem>>, vector<16x256xbf16>,
    %c0_94 = arith.constant 0 : index
    %c129_95 = arith.constant 129 : index
    %130 = vector.load %arg14[%c0_94, %c129_95] : memref<16x512xf32, #tpu.memory_space<vmem>>, vector<16x256xf32>
    %131 = vector.broadcast %40 : vector<1x256xf32> to vector<16x256xf32>
    %132 = arith.mulf %130, %131 : vector<16x256xf32>
    %133 = arith.truncf %132 : vector<16x256xf32> to vector<16x256xbf16>
    %c80_96 = arith.constant 80 : index
    %c0_97 = arith.constant 0 : index
    %134 = vector.load %arg15[%c80_96, %c0_97] : memref<144x256xbf16, #tpu.memory_space<vmem>>, vector<16x256xbf16>
    tpu.vector_store %arg15[%c80_96, %c0_97], %133 {strides = array<i32>} : memref<144x256xbf16, #tpu.memory_space<vmem>>, vector<16x256xbf16>,
    %c0_98 = arith.constant 0 : index
    %c143_99 = arith.constant 143 : index
    %135 = vector.load %arg14[%c0_98, %c143_99] : memref<16x512xf32, #tpu.memory_space<vmem>>, vector<16x256xf32>
    %136 = vector.broadcast %39 : vector<1x256xf32> to vector<16x256xf32>
    %137 = arith.mulf %135, %136 : vector<16x256xf32>
    %138 = arith.truncf %137 : vector<16x256xf32> to vector<16x256xbf16>
    %c96_100 = arith.constant 96 : index
    %c0_101 = arith.constant 0 : index
    %139 = vector.load %arg15[%c96_100, %c0_101] : memref<144x256xbf16, #tpu.memory_space<vmem>>, vector<16x256xbf16>
    tpu.vector_store %arg15[%c96_100, %c0_101], %138 {strides = array<i32>} : memref<144x256xbf16, #tpu.memory_space<vmem>>, vector<16x256xbf16>,
    %c0_102 = arith.constant 0 : index
    %c144_103 = arith.constant 144 : index
    %140 = vector.load %arg14[%c0_102, %c144_103] : memref<16x512xf32, #tpu.memory_space<vmem>>, vector<16x256xf32>
    %141 = arith.truncf %140 : vector<16x256xf32> to vector<16x256xbf16>
    %c112_104 = arith.constant 112 : index
    %c0_105 = arith.constant 0 : index
    %142 = vector.load %arg15[%c112_104, %c0_105] : memref<144x256xbf16, #tpu.memory_space<vmem>>, vector<16x256xbf16>
    tpu.vector_store %arg15[%c112_104, %c0_105], %141 {strides = array<i32>} : memref<144x256xbf16, #tpu.memory_space<vmem>>, vector<16x256xbf16>,
    %c0_106 = arith.constant 0 : index
    %c145_107 = arith.constant 145 : index
    %143 = vector.load %arg14[%c0_106, %c145_107] : memref<16x512xf32, #tpu.memory_space<vmem>>, vector<16x256xf32>
    %144 = vector.broadcast %40 : vector<1x256xf32> to vector<16x256xf32>
    %145 = arith.mulf %143, %144 : vector<16x256xf32>
    %146 = arith.truncf %145 : vector<16x256xf32> to vector<16x256xbf16>
    %c128_108 = arith.constant 128 : index
    %c0_109 = arith.constant 0 : index
    %147 = vector.load %arg15[%c128_108, %c0_109] : memref<144x256xbf16, #tpu.memory_space<vmem>>, vector<16x256xbf16>
    tpu.vector_store %arg15[%c128_108, %c0_109], %146 {strides = array<i32>} : memref<144x256xbf16, #tpu.memory_space<vmem>>, vector<16x256xbf16>,
    %c0_110 = arith.constant 0 : index
    %c0_111 = arith.constant 0 : index
    %148 = vector.load %arg15[%c0_110, %c0_111] : memref<144x256xbf16, #tpu.memory_space<vmem>>, vector<144x256xbf16>
    %cst_112 = arith.constant dense<0.000000e+00> : vector<16x256xf32>
    %149 = tpu.matmul %41, %148, %cst_112 {dimension_numbers = #tpu.dot_dimension_numbers<[1], [0], [0], [1], [0, 0, 1, 1], [], []>} : vector<16x144xbf16>, vector<144x256xbf16>, vector<16x256xf32> -> vector<16x256xf32>
    %150 = vector.broadcast %42 : vector<16x1xf32> to vector<16x256xf32>
    %151 = arith.addf %149, %150 : vector<16x256xf32>
    %cst_113 = arith.constant 0.000000e+00 : f32
    %152 = vector.broadcast %cst_113 : f32 to vector<16x256xf32>
    %153 = arith.maximumf %151, %152 : vector<16x256xf32>
    %c1_114 = arith.constant 1 : index
    %c0_115 = arith.constant 0 : index
    %c0_116 = arith.constant 0 : index
    %154 = vector.load %arg13[%c1_114, %c0_115, %c0_116] : memref<2x16x256xf32, #tpu.memory_space<vmem>>, vector<1x16x256xf32>
    %155 = vector.shape_cast %154 : vector<1x16x256xf32> to vector<16x256xf32>
    %156 = vector.shape_cast %153 : vector<16x256xf32> to vector<1x16x256xf32>
    tpu.vector_store %arg13[%c1_114, %c0_115, %c0_116], %156 {strides = array<i32>} : memref<2x16x256xf32, #tpu.memory_space<vmem>>, vector<1x16x256xf32>,
    return
  }
  func.func @transform_0(%arg0: i32) -> (i32, i32) {
    %c0_i32 = arith.constant 0 : i32
    %c0_i32_0 = arith.constant 0 : i32
    return %c0_i32, %arg0 : i32, i32
  }
  func.func @transform_1(%arg0: i32) -> (i32, i32, i32) {
    %c0_i32 = arith.constant 0 : i32
    %c0_i32_0 = arith.constant 0 : i32
    %c0_i32_1 = arith.constant 0 : i32
    return %arg0, %c0_i32, %c0_i32_0 : i32, i32, i32
  }
  func.func @transform_2(%arg0: i32) -> (i32, i32, i32) {
    %c0_i32 = arith.constant 0 : i32
    %c0_i32_0 = arith.constant 0 : i32
    %c0_i32_1 = arith.constant 0 : i32
    return %arg0, %c0_i32, %c0_i32_0 : i32, i32, i32
  }
  func.func @transform_3(%arg0: i32) -> (i32, i32) {
    %c0_i32 = arith.constant 0 : i32
    %c0_i32_0 = arith.constant 0 : i32
    %c0_i32_1 = arith.constant 0 : i32
    return %c0_i32, %c0_i32_0 : i32, i32
  }
  func.func @transform_4(%arg0: i32) -> (i32, i32) {
    %c0_i32 = arith.constant 0 : i32
    %c0_i32_0 = arith.constant 0 : i32
    %c0_i32_1 = arith.constant 0 : i32
    return %c0_i32, %c0_i32_0 : i32, i32
  }
  func.func @transform_5(%arg0: i32) -> (i32, i32) {
    %c0_i32 = arith.constant 0 : i32
    %c0_i32_0 = arith.constant 0 : i32
    %c0_i32_1 = arith.constant 0 : i32
    return %c0_i32, %c0_i32_0 : i32, i32
  }
  func.func @transform_6(%arg0: i32) -> (i32, i32) {
    %c0_i32 = arith.constant 0 : i32
    %c0_i32_0 = arith.constant 0 : i32
    %c0_i32_1 = arith.constant 0 : i32
    return %c0_i32, %c0_i32_0 : i32, i32
  }
  func.func @transform_7(%arg0: i32) -> (i32, i32) {
    %c0_i32 = arith.constant 0 : i32
    %c0_i32_0 = arith.constant 0 : i32
    %c0_i32_1 = arith.constant 0 : i32
    return %c0_i32, %c0_i32_0 : i32, i32
  }
  func.func @transform_8(%arg0: i32) -> (i32, i32) {
    %c0_i32 = arith.constant 0 : i32
    %c0_i32_0 = arith.constant 0 : i32
    %c0_i32_1 = arith.constant 0 : i32
    return %c0_i32, %c0_i32_0 : i32, i32
  }
  func.func @transform_9(%arg0: i32) -> (i32, i32) {
    %c0_i32 = arith.constant 0 : i32
    %c0_i32_0 = arith.constant 0 : i32
    %c0_i32_1 = arith.constant 0 : i32
    return %c0_i32, %c0_i32_0 : i32, i32
  }
  func.func @transform_10(%arg0: i32) -> (i32, i32) {
    %c0_i32 = arith.constant 0 : i32
    %c0_i32_0 = arith.constant 0 : i32
    %c0_i32_1 = arith.constant 0 : i32
    return %c0_i32, %c0_i32_0 : i32, i32
  }
  func.func @transform_11(%arg0: i32) -> (i32, i32) {
    %c0_i32 = arith.constant 0 : i32
    %c0_i32_0 = arith.constant 0 : i32
    %c0_i32_1 = arith.constant 0 : i32
    return %c0_i32, %c0_i32_0 : i32, i32
  }
  func.func @transform_12(%arg0: i32) -> (i32, i32, i32) {
    %c0_i32 = arith.constant 0 : i32
    %c0_i32_0 = arith.constant 0 : i32
    %c0_i32_1 = arith.constant 0 : i32
    return %arg0, %c0_i32, %c0_i32_0 : i32, i32, i32
  }
}

</mosaic_0001>

<bundles_post_ra>
// kernel: tpu_custom_call.1
= control target key start
LH: loop header
LB: loop body
LE: loop exit
PB: predicated region body
PF: predicated region fallthrough
CT: control target
= control target key end

     0   :  { %s2691_s0 = inlined_call_operand.vmem [shape: f32[19,64], index: 0, kind: input, shape index: {}]   ;;  %s2692_s1 = inlined_call_operand.hbm [shape: bf16[2,32,256], index: 1, kind: input, shape index: {}]   ;;  %s2693_s2 = inlined_call_operand.hbm [shape: bf16[2,8,256], index: 2, kind: input, shape index: {}]   ;;  %s2694_s3 = inlined_call_operand.hbm [shape: f32[2,256], index: 3, kind: input, shape index: {}]   ;;  %s2695_s4 = inlined_call_operand.vmem [shape: f32[24,19], index: 4, kind: input, shape index: {}]   ;;  %s2696_s5 = inlined_call_operand.vmem [shape: f32[24,1], index: 5, kind: input, shape index: {}]   ;;  %s2697_s6 = inlined_call_operand.vmem [shape: f32[2,1], index: 6, kind: input, shape index: {}]   ;;  %s2698_s7 = inlined_call_operand.<no memory space> [shape: f32[1,1], index: 7, kind: input, shape index: {}]   ;;  %s2699_s8 = inlined_call_operand.hbm [shape: f32[8,8], index: 8, kind: input, shape index: {}]   ;;  %s2700_s9 = inlined_call_operand.vmem [shape: f32[8,1], index: 9, kind: input, shape index: {}]   ;;  %s2701_s10 = inlined_call_operand.vmem [shape: bf16[16,144], index: 10, kind: input, shape index: {}]   ;;  %s2702_s11 = inlined_call_operand.vmem [shape: f32[16,1], index: 11, kind: input, shape index: {}]   ;;  %s2703_s12 = inlined_call_operand.hbm [shape: f32[2,16,256], index: 12, kind: output, shape index: {}]  }
   0x1   :  { %v17_v0 = vstv %s2698_s7 }
   0x2   :  { %18 = vst [vmem:[#allocation4] sm:$0x1] %v17_v0 }
   0x3   :  { %19 = vsyncpa [#allocation6], 0 }
   0x4   :  { %20 = vsyncpa [#allocation9], 0 }
   0x5   :  { %21 = vsyncpa [#allocation12], 0 }
   0x6   :  { %22 = vsyncpa [#allocation7], 0  ;;  %s2102_s23 = smov [#allocation8]   ;;  %s2103_s25 = smov [#allocation5]  }
   0x7   :  { %s42_s24 = sshll.u32 %s2102_s23, 4  ;;  %s30_s26 = sshll.u32 %s2103_s25, 4  ;;  %s43_s24 = int_to_ptr.vmem [resolvable:$true] %s42_s24  ;;  %s31_s26 = int_to_ptr.vmem [resolvable:$true] %s30_s26 }
   0x8   :  { %s2002_s27 = scalar_lea.vmem %s43_s24, 256  ;;  %p2007_p1 = scmp.lt.s32.totalorder %s43_s24, %s43_s24 }
   0x9   :  { %p2003_p0 = scmp.ne.s32.totalorder %s43_s24, %s2002_s27  ;;  %p2008_p2 = scmp.lt.s32.totalorder %s2002_s27, %s2002_s27 }
   0xb   :  { %p2009_p3 = por %p2008_p2, %p2007_p1 }
   0xd   :  { %p2010_p4 = pnand %p2009_p3, %p2003_p0 }
   0xf   :  { %2013 = shalt.err (!%p2010_p4)
}
  0x10   :  { %s2104_s28 = smov 128   ;;  %s2105_s7 = smov 8  }
  0x11   :  { %48 = dma.hbm_to_vmem [thread:$0]  %s2693_s2, 256, %s43_s24, [#allocation9], %s2104_s28, %s2104_s28, %s2105_s7  }
  0x12   :  { %s2022_s13 = scalar_lea.vmem %s31_s26, 1024  ;;  %p2027_p6 = scmp.lt.s32.totalorder %s31_s26, %s31_s26 }
  0x13   :  { %p2023_p5 = scmp.ne.s32.totalorder %s31_s26, %s2022_s13  ;;  %p2028_p7 = scmp.lt.s32.totalorder %s2022_s13, %s2022_s13 }
  0x15   :  { %p2029_p8 = por %p2028_p7, %p2027_p6 }
  0x17   :  { %p2030_p9 = pnand %p2029_p8, %p2023_p5 }
  0x19   :  { %2033 = shalt.err (!%p2030_p9)
}
  0x1a   :  { %36 = dma.hbm_to_vmem [thread:$0]  %s2692_s1, 1024, %s31_s26, [#allocation6], %s2104_s28, %s2104_s28, %s2105_s7  }
  0x1b   :  { %s2106_s16 = smov [#allocation10]   ;;  %s2107_s18 = smov [#allocation11]  }
  0x1c   :  { %s55_s17 = sshll.u32 %s2106_s16, 4  ;;  %s73_s19 = sshll.u32 %s2107_s18, 4  ;;  %s56_s17 = int_to_ptr.vmem [resolvable:$true] %s55_s17  ;;  %s74_s19 = int_to_ptr.vmem [resolvable:$true] %s73_s19 }
  0x1d   :  { %s2042_s20 = scalar_lea.vmem %s56_s17, 64  ;;  %p2047_p11 = scmp.lt.s32.totalorder %s56_s17, %s56_s17 }
  0x1e   :  { %p2043_p10 = scmp.ne.s32.totalorder %s56_s17, %s2042_s20  ;;  %p2048_p12 = scmp.lt.s32.totalorder %s2042_s20, %s2042_s20 }
  0x20   :  { %p2049_p13 = por %p2048_p12, %p2047_p11 }
  0x22   :  { %p2050_p0 = pnand %p2049_p13, %p2043_p10 }
  0x24   :  { %2053 = shalt.err (!%p2050_p0)
}
  0x25   :  { %58 = dma.hbm_to_vmem [thread:$0]  %s2694_s3, 64, %s56_s17, [#allocation9]  }
  0x26   :  { %s2062_s22 = scalar_lea.vmem %s74_s19, 128  ;;  %p2067_p2 = scmp.lt.s32.totalorder %s74_s19, %s74_s19 }
  0x27   :  { %p2063_p1 = scmp.ne.s32.totalorder %s74_s19, %s2062_s22  ;;  %p2068_p3 = scmp.lt.s32.totalorder %s2062_s22, %s2062_s22 }
  0x29   :  { %p2069_p4 = por %p2068_p3, %p2067_p2 }
  0x2b   :  { %p2070_p5 = pnand %p2069_p4, %p2063_p1 }
  0x2d   :  { %2073 = shalt.err (!%p2070_p5)
}
  0x2e   :  { %76 = dma.hbm_to_vmem [thread:$0]  %s2699_s8, 128, %s74_s19, [#allocation12]  }
  0x2f   :  { %2094 = dma.done.wait [#allocation6], 1024  }
  0x30   :  { %2095 = vsyncadd [#allocation6], 4294966272 }
  0x31   :  { %2096 = dma.done.wait [#allocation9], 320  }
  0x32   :  { %2097 = vsyncadd [#allocation9], 4294966976 }
  0x33   :  { %2098 = dma.done.wait [#allocation12], 128  }
  0x34   :  { %2099 = vsyncadd [#allocation12], 4294967168  ;;  %v2108_v1 = vmov 0.0   ;;  %vm2109_vm0 = vmmov 0   ;;  %v2110_v2 = vmov 0   ;;  %vm138_vm1 = vcmask 1042432  }
  0x35   :  { %1928 = vmatprep.subr.mxu0 %v2108_v1  ;;  %1934 = vmatprep.mubr.msk.f32.mxu0 %vm2109_vm0, %v2108_v1  ;;  %v106_v3 = vld [vmem:[%s2691_s0 + $0x10] sm:$0x7]  ;;  %v105_v4 = vld [vmem:[%s2691_s0 + $0x8] sm:$0xff]  ;;  %vm264_vm2 = vcmask 64512   ;;  %v104_v5 = vld [vmem:[%s2691_s0] sm:$0xff]  ;;  %vm128_vm3 = vcmask 154624   ;;  %v246_v17 = vlaneseq }
  0x36   :  { %1943 = vmatprep.subr.mxu1 %v2108_v1  ;;  %1945 = vmatprep.mubr.msk.f32.mxu1 %vm2109_vm0, %v2108_v1  ;;  %v257_v6 = vld [vmem:[#allocation11] sm:$0xff]  ;;  %v110_v7 = vld [vmem:[%s2696_s5] sm:$0xff]  ;;  %v111_v10 = vld [vmem:[%s2696_s5 + $0x8] sm:$0xff]  ;;  %s2113_s21 = smov 127   ;;  %s2114_s22 = smov 113   ;;  %v2118_v31 = vmov 0.0|0.0  }
  0x37   :  { %1969 = vset.pattern.permute.xlu0 %v2110_v2  ;;  %1970 = vset.pattern.permute.xlu1 %v2110_v2  ;;  %v107_v8 = vld [vmem:[%s2695_s4] sm:$0xff]  ;;  %v112_v9 = vld [vmem:[%s2696_s5 + $0x10] sm:$0xff]  ;;  %v108_v12 = vld [vmem:[%s2695_s4 + $0x8] sm:$0xff]  ;;  %v247_v20 = vshrl.u32 %v246_v17, 7  ;;  %s2115_s1 = smov 111   ;;  %s2116_s23 = smov 17  }
  0x38   :  { %1929 = vmatpush3.msk.msra.mxu0 %vm138_vm1, %v106_v3  ;;  %1944 = vmatpush3.msra.mxu1 %v105_v4  ;;  %v225_v11 = vld [vmem:[%s2697_s6] sm:$0x3]  ;;  %v109_v15 = vld [vmem:[%s2695_s4 + $0x10] sm:$0xff]  ;;  %s2111_s4 = smov 15   ;;  %s2117_s3 = smov 112   ;;  %vm232_vm4 = vcmask 517120  }
  0x39   :  { %1930 = vmatprep.subr.mxu0 %v2108_v1  ;;  %1946 = vmatmul.mubr.msk.f32.vlgmr.msra.gmra.mxu1 %vm264_vm2, %v257_v6  ;;  %v240_v13 = vld [vmem:[#allocation4] sm:$0x1]  ;;  %v1971_v18 = vld [vmem:[#allocation5 + $0x10] ss:$8 sps:$4 sm:$0xff]   ;;  %v1976_v19 = vld [vmem:[#allocation5 + $0x4] ss:$8 sps:$4 sm:$0xff]  }
  0x3a   :  { %1931 = vmatpush3.msra.mxu0 %v105_v4  ;;  %115 = vperm.xlu0 %1969, %v110_v7   ;;  %v258_v14 = vld [vmem:[%s2700_s9] sm:$0xff]  ;;  %v2254_v22 = vsub.s32 0, %v247_v20  ;;  %v341_v23 = vld [vmem:[#allocation10] ss:$2 sm:$0x3]  ;;  %v437_v24 = vsub.s32 1, %v247_v20 }
  0x3b   :  { %1932 = vmatprep.subr.mxu0 %v2108_v1  ;;  %120 = vperm.xlu1 %1970, %v111_v10   ;;  %v1973_v16 = vld [vmem:[#allocation5 + $0x14] ss:$8 sps:$4 sm:$0xff]   ;;  %v1974_v21 = vld [vmem:[#allocation5] ss:$8 sps:$4 sm:$0xff]   ;;  %s2112_s9 = smov 1   ;;  %vm594_vm5 = vcmask 121856  }
  0x3c   :  { %1933 = vmatpush3.msra.mxu0 %v104_v5  ;;  %408 = vmatprep.mubr.bf16.mxu1 %v2110_v2  ;;  %v434_v25 = vrot.slane %v341_v23, %v2254_v22  ;;  %v343_v26 = vld [vmem:[#allocation10 + $0x1] ss:$2 sm:$0x3]  ;;  %v438_v27 = vrot.slane %v341_v23, %v437_v24  ;;  %v2270_v30 = vld [vmem:[#allocation8] sm:$0xff]  ;;  %vm652_vm6 = vcmask 7168   ;;  %vm612_vm7 = vcmask 1039360  }
  0x3d   :  { %1935 = vmatmul.mubr.msk.f32.vlgmr.msra.gmra.mxu0 %vm128_vm3, %v107_v8  ;;  %388 = vmatprep.subr.bf16.mxu1 %v1973_v16  ;;  %v545_v28 = vrot.slane %v343_v26, %v2254_v22  ;;  %v549_v29 = vrot.slane %v343_v26, %v437_v24  ;;  %v2280_v3 = vunpack.c.l.bf16 %v2270_v30  ;;  %v2283_v4 = vunpack.c.h.bf16 %v2270_v30  ;;  %s2119_s8 = smov 16   ;;  %s2120_s26 = smov 96  }
  0x3e   :  { %1937 = vmatprep.mubr.msk.f32.mxu0 %vm2109_vm0, %v2108_v1  ;;  %125 = vperm.xlu0 %1969, %v112_v9   ;;  %vm372_vm8 = vcmask 261120   ;;  %vm554_vm9 = vcmask 924672   ;;  %vm443_vm10 = vcmask 908288   ;;  %vm484_vm11 = vcmask 138240  }
  0x3f   :  { %228 = vperm.xlu1 %1970, %v225_v11   ;;  %389 = vmatpush1.bf16.msra.mxu1 %v1971_v18  ;;  %vm527_vm12 = vcmask 130048   ;;  %vm482_vm13 = vcmask 1043456   ;;  %vm829_vm14 = vcmask 916480  }
  0x40   :  { %390 = vmatprep.subr.bf16.mxu1 %v1976_v19 }
  0x41   :  { %1938 = vmatmul.mubr.msk.f32.gmra.mxu0 %vm128_vm3, %v108_v12 }
  0x42   :  { %1940 = vmatprep.mubr.msk.f32.mxu0 %vm2109_vm0, %v2108_v1  ;;  %243 = vperm.xlu0 %1969, %v240_v13  }
  0x43   :  { %261 = vperm.xlu1 %1970, %v258_v14   ;;  %391 = vmatpush1.bf16.msra.mxu1 %v1974_v21 }
  0x45   :  { %1941 = vmatmul.mubr.msk.f32.gmra.mxu0 %vm128_vm3, %v109_v15 }
  0x46   :  { %742 = vrot.lane.b32.xlu0 %v434_v25, %s2111_s4 }
  0x47   :  { %744 = vrot.lane.b32.xlu1 %v438_v27, %s2111_s4 }
  0x4a   :  { %684 = vrot.lane.b32.xlu0 %v545_v28, %s2112_s9 }
  0x4b   :  { %686 = vrot.lane.b32.xlu1 %v549_v29, %s2112_s9 }
  0x4e   :  { %608 = vrot.lane.b32.xlu0 %v434_v25, %s2113_s21 }
  0x4f   :  { %610 = vrot.lane.b32.xlu1 %v438_v27, %s2113_s21 }
  0x52   :  { %550 = vrot.lane.b32.xlu0 %v545_v28, %s2114_s22 }
  0x53   :  { %552 = vrot.lane.b32.xlu1 %v549_v29, %s2114_s22 }
  0x56   :  { %439 = vrot.lane.b32.xlu0 %v434_v25, %s2115_s1 }
  0x57   :  { %441 = vrot.lane.b32.xlu1 %v438_v27, %s2115_s1 }
  0x5a   :  { %843 = vrot.lane.b32.xlu0 %v545_v28, %s2116_s23 }
  0x5b   :  { %845 = vrot.lane.b32.xlu1 %v549_v29, %s2116_s23 }
  0x5e   :  { %820 = vrot.lane.b32.xlu0 %v2270_v30, %s2117_s3 }
  0x5f   :  { %818 = vrot.lane.b32.xlu1 %v2118_v31, %s2117_s3 }
  0x63   :  { %822 = vrot.lane.b32.xlu1 %v2118_v31, %s2117_s3 }
  0xb5   :  { %v116_v35 = vpop.permute.xlu0 %115 }
  0xb6   :  { %v121_v43 = vpop.permute.xlu1 %120 }
  0xb9   :  { %v126_v39 = vpop.permute.xlu0 %125 }
  0xba   :  { %v229_v49 = vpop.permute.xlu1 %228 }
  0xbd   :  { %v244_v56 = vpop.permute.xlu0 %243 }
  0xbe   :  { %v249_v58 = vrot.slane %v244_v56, %v2254_v22  ;;  %v262_v0 = vpop.permute.xlu1 %261 }
  0xc1   :  { %v2285_v5 = vpop.permute.xlu0 %742 }
  0xc2   :  { %v745_v7 = vpop.permute.xlu1 %744  ;;  %v754_v8 = vmul.f32 %v2285_v5, %v2280_v3 }
  0xc3   :  { %v753_v9 = vmul.f32 0.0, %v745_v7  ;;  %v2291_v10 = vsel %vm594_vm5, %v2285_v5, %v745_v7 }
  0xc4   :  { %v755_v11 = vmul.f32 %v2291_v10, %v2283_v4 }
  0xc5   :  { %v2295_v12 = vpack.c.bf16 %v753_v9, %v753_v9  ;;  %v2297_v13 = vpop.permute.xlu0 %684 }
  0xc6   :  { %v687_v15 = vpop.permute.xlu1 %686  ;;  %v1874_v16 = vpack.c.bf16 %v755_v11, %v754_v8  ;;  %v696_v17 = vmul.f32 %v2297_v13, %v2280_v3 }
  0xc7   :  { %775 = vrot.lane.b32.xlu1 %v2295_v12, %s2114_s22  ;;  %v695_v19 = vmul.f32 0.0, %v687_v15  ;;  %v2305_v20 = vsel %vm652_vm6, %v2297_v13, %v687_v15 }
  0xc8   :  { %777 = vrot.lane.b32.xlu0 %v1874_v16, %s2114_s22  ;;  %v697_v22 = vmul.f32 %v2305_v20, %v2283_v4 }
  0xc9   :  { %v609_v23 = vpop.permute.xlu0 %608  ;;  %v2316_v28 = vpack.c.bf16 %v695_v19, %v695_v19  ;;  %v1856_v19 = vpack.c.bf16 %v2280_v3, %v2108_v1 }
  0xca   :  { %v2312_v25 = vpop.permute.xlu1 %610  ;;  %v2314_v26 = vmul.f32 0.0, %v609_v23  ;;  %v1870_v27 = vpack.c.bf16 %v697_v22, %v696_v17 }
  0xcb   :  { %779 = vrot.lane.b32.xlu1 %v2295_v12, %s2114_s22  ;;  %v2322_v29 = vsel %vm612_vm7, %v609_v23, %v2312_v25 }
  0xcc   :  { %719 = vrot.lane.b32.xlu0 %v1870_v27, %s2113_s21 }
  0xcf   :  { %717 = vrot.lane.b32.xlu1 %v2316_v28, %s2113_s21 }
  0xd3   :  { %721 = vrot.lane.b32.xlu1 %v2316_v28, %s2113_s21 }
  0xf9   :  { %v334_v32 = vpop.f32.mrf.mxu1 }
  0xfa   :  { %v335_v6 = vadd.f32 %v334_v32, %v262_v0  ;;  %v621_v32 = vmul.f32 %v2322_v29, %v2280_v3 }
  0xfb   :  { %v1947_v33 = vpop.f32.mrf.mxu1 }
  0xfc   :  { %v338_v14 = vmax.f32 %v335_v6, 0.0  ;;  %v551_v33 = vpop.permute.xlu0 %550 }
  0xfd   :  { %v208_v34 = vpop.f32.mrf.mxu0 }
  0xfe   :  { %v209_v41 = vadd.f32 %v208_v34, %v116_v35  ;;  %v2329_v34 = vpop.permute.xlu1 %552  ;;  %v2331_v35 = vmul.f32 0.0, %v551_v33 }
  0xff   :  { %v1936_v36 = vpop.f32.mrf.mxu0 }
 0x100   :  { %v1864_v36 = vpack.c.bf16 %v621_v32, %v2314_v26  ;;  %v440_v15 = vpop.permute.xlu0 %439 }
 0x101   :  { %v213_v37 = vpop.f32.mrf.mxu0  ;;  %v2415_v22 = vmul.f32 0.0, %v440_v15 }
 0x102   :  { %v214_v45 = vadd.f32 %v213_v37, %v121_v43  ;;  %v2338_v37 = vsel %vm554_vm9, %v551_v33, %v2329_v34  ;;  %643 = vrot.lane.b32.xlu0 %v1864_v36, %s2112_s9 }
 0x103   :  { %v1939_v38 = vpop.f32.mrf.mxu0 }
 0x104   :  { %v622_v38 = vmul.f32 %v2312_v25, %v2283_v4  ;;  %v2419_v32 = vpop.permute.xlu0 %843 }
 0x105   :  { %v218_v40 = vpop.f32.mrf.mxu0 }
 0x106   :  { %v219_v42 = vadd.f32 %v218_v40, %v126_v39  ;;  %v563_v39 = vmul.f32 %v2338_v37, %v2280_v3 }
 0x107   :  { %v1942_v44 = vpop.f32.mrf.mxu0 }
 0x108   :  { %v222_v46 = vmul.f32 %v219_v42, %v209_v41  ;;  %v1860_v40 = vpack.c.bf16 %v563_v39, %v2331_v35  ;;  %v1865_v41 = vpack.c.bf16 %v622_v38, %v622_v38  ;;  %v564_v42 = vmul.f32 %v2329_v34, %v2283_v4 }
 0x10a   :  { %v223_v47 = vadd.f32 %v222_v46, %v214_v45  ;;  %585 = vrot.lane.b32.xlu0 %v1860_v40, %s2111_s4  ;;  %645 = vrot.lane.b32.xlu1 %v1865_v41, %s2112_s9  ;;  %v1861_v43 = vpack.c.bf16 %v564_v42, %v564_v42 }
 0x10c   :  { %1988 = vtanh.f32 %v223_v47 }
 0x10e   :  { %587 = vrot.lane.b32.xlu1 %v1861_v43, %s2111_s4 }
 0x119   :  { %v1989_v48 = vpop.eup %1988 }
 0x11a   :  { %v231_v50 = vmul.f32 %v1989_v48, %v229_v49  ;;  %v2365_v49 = vpop.permute.xlu1 %441 }
 0x11c   :  { %v233_v51 = vsel %vm232_vm4, %v231_v50, 0.0 }
 0x11d   :  { %v234_v52 = vrot.slane %v233_v51, 4 }
 0x11e   :  { %v846_v6 = vpop.permute.xlu1 %845 }
 0x11f   :  { %v235_v53 = vadd.f32 %v234_v52, %v233_v51  ;;  %v1918_v51 = vcombine.high %v2270_v30, %v2270_v30  ;;  %v453_v52 = vmul.f32 %v2365_v49, %v2283_v4  ;;  %v854_v7 = vmul.f32 0.0, %v846_v6 }
 0x120   :  { %v2434_v40 = vsel %vm484_vm11, %v2419_v32, %v846_v6 }
 0x121   :  { %v236_v54 = vrot.slane %v235_v53, 2  ;;  %v1853_v56 = vpack.c.bf16 %v453_v52, %v453_v52  ;;  %v856_v52 = vmul.f32 %v2434_v40, %v2283_v4 }
 0x123   :  { %v237_v55 = vadd.f32 %v236_v54, %v235_v53 }
 0x125   :  { %v238_v57 = vrot.slane %v237_v55, 1 }
 0x127   :  { %v239_v59 = vadd.f32 %v238_v57, %v237_v55 }
 0x129   :  { %v250_v60 = vadd.f32 %v249_v58, %v239_v59 }
 0x12b   :  { %v1730_v61 = vmul.f32 -1.442695, %v250_v60 }
 0x12d   :  { %1990 = vpow2.f32 %v1730_v61 }
 0x13a   :  { %v1991_v62 = vpop.eup %1990 }
 0x13b   :  { %v254_v63 = vadd.f32 1.0, %v1991_v62 }
 0x13d   :  { %1992 = vrcp.f32 %v254_v63 }
 0x14a   :  { %v1993_v18 = vpop.eup %1992 }
 0x14b   :  { %v339_v21 = vmul.f32 %v1993_v18, %v338_v14  ;;  %v2396_v14 = vpack.c.bf16 %v854_v7, %v854_v7  ;;  %v2406_v18 = vsel %vm443_vm10, %v440_v15, %v2365_v49 }
 0x14c   :  { %v452_v39 = vmul.f32 %v2406_v18, %v2280_v3 }
 0x14d   :  { %v2310_v24 = vpack.c.bf16 %v339_v21, %v339_v21  ;;  %v2413_v21 = vld [vmem:[#allocation8 + $0x8] sm:$0xff] }
 0x14e   :  { %v2424_v33 = vunpack.c.l.bf16 %v2413_v21  ;;  %v2427_v36 = vunpack.c.h.bf16 %v2413_v21  ;;  %v1852_v43 = vpack.c.bf16 %v452_v39, %v2415_v22 }
 0x14f   :  { %1736 = vmatmul.mubr.msk.bf16.vlgmr.msra.gmra.mxu1 %vm372_vm8, %v2310_v24 }
 0x150   :  { %v1418_v41 = vmul.f32 %v2424_v33, %v2285_v5  ;;  %v1419_v42 = vmul.f32 %v2427_v36, %v2291_v10  ;;  %v1305_v4 = vmul.f32 %v2424_v33, %v2322_v29 }
 0x20f   :  { %v2353_v44 = vpop.f32.mrf.mxu1 }
 0x210   :  { %v618_v48 = vmul.f32 %v2322_v29, %v2353_v44  ;;  %v560_v55 = vmul.f32 %v2338_v37, %v2353_v44  ;;  %v751_v60 = vmul.f32 %v2285_v5, %v2353_v44  ;;  %v693_v8 = vmul.f32 %v2297_v13, %v2353_v44 }
 0x211   :  { %v2355_v45 = vpop.f32.mrf.mxu1  ;;  %v1854_v16 = vpack.c.bf16 %v2353_v44, %v2108_v1  ;;  %v449_v27 = vmul.f32 %v2406_v18, %v2353_v44 }
 0x212   :  { %v2359_v46 = vpack.c.bf16 %v2355_v45, %v2353_v44  ;;  %v1855_v47 = vpack.c.bf16 %v2355_v45, %v2355_v45  ;;  %v1862_v54 = vpack.c.bf16 %v618_v48, %v2314_v26  ;;  %v1858_v57 = vpack.c.bf16 %v560_v55, %v2331_v35  ;;  %v1980_v55 = vld [vmem:[%s2701_s10 + $0x4] ss:$8 sps:$4 sm:$0xff]  }
 0x213   :  { %v414_v50 = vpop.f32.mrf.mxu1  ;;  %v752_v58 = vmul.f32 %v2291_v10, %v2355_v45  ;;  %v619_v59 = vmul.f32 %v2312_v25, %v2355_v45  ;;  %v694_v63 = vmul.f32 %v2305_v20, %v2355_v45  ;;  %v561_v0 = vmul.f32 %v2329_v34, %v2355_v45  ;;  %1791 = vmatprep.mubr.msk.bf16.mxu0 %vm527_vm12, %v1980_v55 }
 0x214   :  { %816 = vrot.lane.b32.xlu0 %v2359_v46, %s2117_s3  ;;  %516 = vrot.lane.b32.xlu1 %v1855_v47, %s2119_s8  ;;  %v450_v17 = vmul.f32 %v2365_v49, %v2355_v45  ;;  %v1850_v38 = vpack.c.bf16 %v449_v27, %v2415_v22  ;;  %v853_v47 = vmul.f32 %v2434_v40, %v2355_v45 }
 0x215   :  { %v415_v53 = vpop.f32.mrf.mxu1  ;;  %v1872_v61 = vpack.c.bf16 %v752_v58, %v751_v60  ;;  %v1863_v62 = vpack.c.bf16 %v619_v59, %v619_v59  ;;  %v1868_v9 = vpack.c.bf16 %v694_v63, %v693_v8  ;;  %v1859_v11 = vpack.c.bf16 %v561_v0, %v561_v0  ;;  %1849 = vmatprep.mubr.msk.bf16.mxu1 %vm527_vm12, %v1980_v55  ;;  %v819_v59 = vpop.permute.xlu1 %818 }
 0x216   :  { %v1851_v23 = vpack.c.bf16 %v450_v17, %v450_v17  ;;  %v852_v48 = vmul.f32 %v2419_v32, %v2353_v44  ;;  %v1908_v50 = vpack.c.bf16 %v1419_v42, %v1418_v41  ;;  %v1371_v45 = vmul.f32 %v2427_v36, %v2305_v20  ;;  %v821_v0 = vpop.permute.xlu0 %820 }
 0x218   :  { %639 = vrot.lane.b32.xlu0 %v1862_v54, %s2112_s9  ;;  %520 = vrot.lane.b32.xlu1 %v1918_v51, %s2119_s8  ;;  %v1370_v51 = vmul.f32 %v2424_v33, %v2297_v13  ;;  %v1880_v53 = vpack.c.bf16 %v853_v47, %v852_v48  ;;  %v855_v54 = vmul.f32 %v2419_v32, %v2280_v3 }
 0x21a   :  { %v1882_v3 = vpack.c.bf16 %v856_v52, %v855_v54  ;;  %v1904_v44 = vpack.c.bf16 %v1371_v45, %v1370_v51  ;;  %v778_v7 = vpop.permute.xlu0 %777 }
 0x21b   :  { %v783_v55 = vrot.slane %v778_v7, 4 }
 0x21c   :  { %581 = vrot.lane.b32.xlu0 %v1858_v57, %s2111_s4  ;;  %476 = vrot.lane.b32.xlu1 %v1853_v56, %s2116_s23  ;;  %v1257_v56 = vmul.f32 %v2424_v33, %v2338_v37  ;;  %v1898_v57 = vpack.c.bf16 %v1305_v4, %v2314_v26 }
 0x21e   :  { %v1894_v58 = vpack.c.bf16 %v1257_v56, %v2331_v35 }
 0x220   :  { %773 = vrot.lane.b32.xlu0 %v1872_v61, %s2114_s22  ;;  %641 = vrot.lane.b32.xlu1 %v1863_v62, %s2112_s9  ;;  %v823_v62 = vpop.permute.xlu1 %822 }
 0x221   :  { %v827_v17 = vrot.slane %v823_v62, 4 }
 0x224   :  { %715 = vrot.lane.b32.xlu0 %v1868_v9, %s2113_s21  ;;  %583 = vrot.lane.b32.xlu1 %v1859_v11, %s2111_s4  ;;  %v720_v9 = vpop.permute.xlu0 %719 }
 0x228   :  { %514 = vrot.lane.b32.xlu0 %v1854_v16, %s2119_s8  ;;  %876 = vrot.lane.b32.xlu1 %v2396_v14, %s2115_s1 }
 0x22c   :  { %518 = vrot.lane.b32.xlu0 %v1856_v19, %s2119_s8  ;;  %472 = vrot.lane.b32.xlu1 %v1851_v23, %s2116_s23  ;;  %v826_v19 = vrot.slane %v821_v0, 4 }
 0x22e   :  { %v831_v39 = vsel %vm482_vm13, %v826_v19, %v827_v17 }
 0x230   :  { %470 = vrot.lane.b32.xlu0 %v1850_v38, %s2116_s23  ;;  %880 = vrot.lane.b32.xlu1 %v2396_v14, %s2115_s1  ;;  %v825_v38 = vrot.slane %v819_v59, 4 }
 0x234   :  { %474 = vrot.lane.b32.xlu0 %v1852_v43, %s2116_s23  ;;  %1483 = vrot.lane.b32.xlu1 %v2413_v21, %s2117_s3  ;;  %v832_v43 = vsel %vm829_vm14, %v821_v0, %v831_v39 }
 0x238   :  { %874 = vrot.lane.b32.xlu0 %v1880_v53, %s2115_s1  ;;  %1441 = vrot.lane.b32.xlu1 %v1908_v50, %s2114_s22 }
 0x23c   :  { %878 = vrot.lane.b32.xlu0 %v1882_v3, %s2115_s1  ;;  %1393 = vrot.lane.b32.xlu1 %v1904_v44, %s2113_s21  ;;  %v725_v3 = vrot.slane %v720_v9, 4 }
 0x240   :  { %1083 = vrot.lane.b32.xlu0 %v2310_v24, %s2120_s26  ;;  %1327 = vrot.lane.b32.xlu1 %v1898_v57, %s2112_s9  ;;  %v1306_v24 = vmul.f32 %v2427_v36, %v2312_v25 }
 0x242   :  { %v1899_v60 = vpack.c.bf16 %v1306_v24, %v1306_v24 }
 0x244   :  { %1481 = vrot.lane.b32.xlu0 %v2118_v31, %s2117_s3  ;;  %1279 = vrot.lane.b32.xlu1 %v1894_v58, %s2111_s4 }
 0x248   :  { %1485 = vrot.lane.b32.xlu0 %v2118_v31, %s2117_s3  ;;  %v1258_v31 = vmul.f32 %v2427_v36, %v2329_v34 }
 0x24a   :  { %v1895_v61 = vpack.c.bf16 %v1258_v31, %v1258_v31 }
 0x24c   :  { %1439 = vrot.lane.b32.xlu0 %v2295_v12, %s2114_s22 }
 0x250   :  { %1443 = vrot.lane.b32.xlu0 %v2295_v12, %s2114_s22  ;;  %v776_v12 = vpop.permute.xlu1 %775 }
 0x251   :  { %v782_v57 = vrot.slane %v776_v12, 4 }
 0x254   :  { %1391 = vrot.lane.b32.xlu0 %v2316_v28, %s2113_s21  ;;  %v780_v63 = vpop.permute.xlu1 %779 }
 0x255   :  { %v784_v45 = vrot.slane %v780_v63, 4 }
 0x257   :  { %v788_v58 = vsel %vm482_vm13, %v783_v55, %v784_v45 }
 0x258   :  { %1395 = vrot.lane.b32.xlu0 %v2316_v28, %s2113_s21  ;;  %v718_v6 = vpop.permute.xlu1 %717  ;;  %v2495_v28 = vpop.permute.xlu0 %643  ;;  %v789_v31 = vsel %vm554_vm9, %v778_v7, %v788_v58 }
 0x259   :  { %v649_v12 = vrot.slane %v2495_v28, 4 }
 0x25c   :  { %1329 = vrot.lane.b32.xlu0 %v1899_v60, %s2112_s9  ;;  %v722_v8 = vpop.permute.xlu1 %721  ;;  %v2499_v16 = vpop.permute.xlu0 %585  ;;  %v724_v60 = vrot.slane %v718_v6, 4 }
 0x25d   :  { %v726_v4 = vrot.slane %v722_v8, 4  ;;  %v591_v45 = vrot.slane %v2499_v16, 4 }
 0x260   :  { %1281 = vrot.lane.b32.xlu0 %v1895_v61, %s2111_s4  ;;  %v646_v11 = vpop.permute.xlu1 %645  ;;  %v730_v61 = vsel %vm482_vm13, %v725_v3, %v726_v4 }
 0x261   :  { %v731_v6 = vsel %vm612_vm7, %v720_v9, %v730_v61  ;;  %v1782_v9 = vcombine.high %v2359_v46, %v2270_v30 }
 0x264   :  { %v2497_v15 = vpop.permute.xlu1 %587 }
 0x265   :  { %v592_v55 = vrot.slane %v2497_v15, 4  ;;  %v1781_v15 = vcombine.low %v2359_v46, %v2270_v30 }
 0x286   :  { %v817_v23 = vpop.permute.xlu0 %816  ;;  %v2501_v27 = vpop.permute.xlu1 %516 }
 0x287   :  { %v824_v41 = vrot.slane %v817_v23, 4 }
 0x289   :  { %v828_v42 = vsel %vm482_vm13, %v824_v41, %v825_v38  ;;  %v650_v38 = vrot.slane %v646_v11, 4 }
 0x28a   :  { %v830_v47 = vsel %vm829_vm14, %v817_v23, %v828_v42  ;;  %v640_v48 = vpop.permute.xlu0 %639  ;;  %v2507_v50 = vpop.permute.xlu1 %520 }
 0x28b   :  { %v1787_v51 = vcombine.low %v830_v47, %v832_v43  ;;  %v1788_v52 = vcombine.high %v830_v47, %v832_v43  ;;  %v647_v39 = vrot.slane %v640_v48, 4  ;;  %v654_v11 = vsel %vm482_vm13, %v649_v12, %v650_v38 }
 0x28d   :  { %1026 = vmatprep.subr.bf16.mxu0 %v1788_v52 }
 0x28e   :  { %1027 = vmatpush1.bf16.msra.mxu0 %v1787_v51  ;;  %v582_v53 = vpop.permute.xlu0 %581  ;;  %v2509_v54 = vpop.permute.xlu1 %476 }
 0x28f   :  { %v589_v4 = vrot.slane %v582_v53, 4 }
 0x292   :  { %v774_v44 = vpop.permute.xlu0 %773  ;;  %v642_v56 = vpop.permute.xlu1 %641 }
 0x293   :  { %v781_v24 = vrot.slane %v774_v44, 4  ;;  %v648_v8 = vrot.slane %v642_v56, 4 }
 0x295   :  { %v785_v59 = vsel %vm482_vm13, %v781_v24, %v782_v57  ;;  %v651_v43 = vsel %vm482_vm13, %v647_v39, %v648_v8  ;;  %v655_v24 = vsel %vm652_vm6, %v2495_v28, %v654_v11 }
 0x296   :  { %v787_v62 = vsel %vm554_vm9, %v774_v44, %v785_v59  ;;  %v716_v0 = vpop.permute.xlu0 %715  ;;  %v584_v23 = vpop.permute.xlu1 %583  ;;  %v653_v56 = vsel %vm652_vm6, %v640_v48, %v651_v43  ;;  %v596_v59 = vsel %vm482_vm13, %v591_v45, %v592_v55 }
 0x297   :  { %v1785_v63 = vcombine.low %v787_v62, %v789_v31  ;;  %v1786_v17 = vcombine.high %v787_v62, %v789_v31  ;;  %v723_v19 = vrot.slane %v716_v0, 4  ;;  %v590_v52 = vrot.slane %v584_v23, 4 }
 0x298   :  { %v1780_v61 = vcombine.high %v653_v56, %v655_v24  ;;  %v597_v28 = vsel %vm594_vm5, %v2499_v16, %v596_v59  ;;  %v1779_v30 = vcombine.low %v653_v56, %v655_v24  ;;  %v2554_v59 = vld [vmem:[%s2701_s10] ss:$8 sps:$4 sm:$0xff]  }
 0x299   :  { %v727_v41 = vsel %vm482_vm13, %v723_v19, %v724_v60  ;;  %1028 = vmatprep.subr.bf16.mxu0 %v1786_v17  ;;  %v593_v57 = vsel %vm482_vm13, %v589_v4, %v590_v52  ;;  %v525_v60 = vrot.slane %v2507_v50, 4 }
 0x29a   :  { %v729_v7 = vsel %vm612_vm7, %v716_v0, %v727_v41  ;;  %1029 = vmatpush1.bf16.msra.mxu0 %v1785_v63  ;;  %v515_v42 = vpop.permute.xlu0 %514  ;;  %v877_v3 = vpop.permute.xlu1 %876  ;;  %v595_v48 = vsel %vm594_vm5, %v582_v53, %v593_v57  ;;  %v523_v0 = vrot.slane %v2501_v27, 4  ;;  %v481_v53 = vrot.slane %v2509_v54, 4 }
 0x29b   :  { %v1783_v47 = vcombine.low %v729_v7, %v731_v6  ;;  %v1784_v51 = vcombine.high %v729_v7, %v731_v6  ;;  %v522_v31 = vrot.slane %v515_v42, 4  ;;  %v1778_v50 = vcombine.high %v595_v48, %v597_v28 }
 0x29c   :  { %v1777_v39 = vcombine.low %v595_v48, %v597_v28  ;;  %v883_v52 = vrot.slane %v877_v3, 4  ;;  %v1983_v3 = vld [vmem:[#allocation5 + $0x34] ss:$8 sps:$4 sm:$0xff]  }
 0x29d   :  { %1030 = vmatprep.subr.bf16.mxu0 %v1784_v51  ;;  %v526_v46 = vsel %vm482_vm13, %v522_v31, %v523_v0  ;;  %v1986_v31 = vld [vmem:[#allocation5 + $0x24] ss:$8 sps:$4 sm:$0xff]  }
 0x29e   :  { %1031 = vmatpush1.bf16.msra.mxu0 %v1783_v47  ;;  %v519_v44 = vpop.permute.xlu0 %518  ;;  %v473_v17 = vpop.permute.xlu1 %472  ;;  %v528_v12 = vsel %vm527_vm12, %v515_v42, %v526_v46 }
 0x29f   :  { %v524_v58 = vrot.slane %v519_v44, 4  ;;  %1032 = vmatprep.subr.bf16.mxu0 %v1782_v9  ;;  %v479_v38 = vrot.slane %v473_v17, 4 }
 0x2a1   :  { %v529_v63 = vsel %vm482_vm13, %v524_v58, %v525_v60  ;;  %v1981_v60 = vld [vmem:[#allocation5 + $0x30] ss:$8 sps:$4 sm:$0xff]  }
 0x2a2   :  { %v471_v62 = vpop.permute.xlu0 %470  ;;  %1033 = vmatpush1.bf16.msra.mxu0 %v1781_v15  ;;  %v530_v19 = vsel %vm527_vm12, %v519_v44, %v529_v63  ;;  %v881_v11 = vpop.permute.xlu1 %880 }
 0x2a3   :  { %1034 = vmatprep.subr.bf16.mxu0 %v1780_v61  ;;  %v478_v8 = vrot.slane %v471_v62, 4  ;;  %v1776_v41 = vcombine.high %v528_v12, %v530_v19  ;;  %v1775_v51 = vcombine.low %v528_v12, %v530_v19  ;;  %v885_v42 = vrot.slane %v881_v11, 4  ;;  %v1984_v61 = vld [vmem:[#allocation5 + $0x20] ss:$8 sps:$4 sm:$0xff]  }
 0x2a4   :  { %v1919_v19 = vcombine.high %v2413_v21, %v2413_v21 }
 0x2a5   :  { %v483_v16 = vsel %vm482_vm13, %v478_v8, %v479_v38 }
 0x2a6   :  { %v475_v23 = vpop.permute.xlu0 %474  ;;  %1035 = vmatpush1.bf16.msra.mxu0 %v1779_v30  ;;  %v485_v54 = vsel %vm484_vm11, %v471_v62, %v483_v16 }
 0x2a7   :  { %v480_v27 = vrot.slane %v475_v23, 4  ;;  %1036 = vmatprep.subr.bf16.mxu0 %v1778_v50 }
 0x2a9   :  { %v486_v6 = vsel %vm482_vm13, %v480_v27, %v481_v53  ;;  %v1168_v27 = vmul.f32 %v2427_v36, %v2365_v49 }
 0x2aa   :  { %v487_v7 = vsel %vm484_vm11, %v475_v23, %v486_v6  ;;  %v875_v43 = vpop.permute.xlu0 %874  ;;  %1037 = vmatpush1.bf16.msra.mxu0 %v1777_v39 }
 0x2ab   :  { %v882_v47 = vrot.slane %v875_v43, 4  ;;  %1038 = vmatprep.subr.bf16.mxu0 %v1776_v41  ;;  %v1774_v45 = vcombine.high %v485_v54, %v487_v7  ;;  %v1773_v44 = vcombine.low %v485_v54, %v487_v7  ;;  %v1887_v12 = vpack.c.bf16 %v1168_v27, %v1168_v27 }
 0x2ad   :  { %v886_v4 = vsel %vm482_vm13, %v882_v47, %v883_v52 }
 0x2ae   :  { %v879_v55 = vpop.permute.xlu0 %878  ;;  %1039 = vmatpush1.bf16.msra.mxu0 %v1775_v51  ;;  %v888_v57 = vsel %vm443_vm10, %v875_v43, %v886_v4 }
 0x2af   :  { %v884_v9 = vrot.slane %v879_v55, 4  ;;  %1040 = vmatprep.subr.bf16.mxu0 %v1774_v45 }
 0x2b1   :  { %v889_v56 = vsel %vm482_vm13, %v884_v9, %v885_v42  ;;  %v1484_v9 = vpop.permute.xlu1 %1483 }
 0x2b2   :  { %v890_v58 = vsel %vm443_vm10, %v879_v55, %v889_v56  ;;  %1041 = vmatpush1.bf16.msra.mxu0 %v1773_v44  ;;  %v1084_v62 = vpop.permute.xlu0 %1083 }
 0x2b3   :  { %v1789_v24 = vcombine.low %v888_v57, %v890_v58  ;;  %v1790_v15 = vcombine.high %v888_v57, %v890_v58 }
 0x2b5   :  { %1056 = vmatprep.subr.bf16.mxu0 %v1790_v15  ;;  %v1489_v15 = vrot.slane %v1484_v9, 4 }
 0x2b6   :  { %1057 = vmatpush2.bf16.msra.mxu0 %v1789_v24  ;;  %v1482_v55 = vpop.permute.xlu0 %1481 }
 0x2b7   :  { %1120 = vmatprep.subr.bf16.mxu0 %v1983_v3 }
 0x2b9   :  { %1059 = vmatmul.mubr.bf16.vlgmr.msra.gmra.mxu0 %v2554_v59 }
 0x2ba   :  { %1121 = vmatpush1.bf16.msra.mxu0 %v1981_v60  ;;  %1140 = vmatprep.mubr.bf16.mxu0 %v2110_v2  ;;  %v1486_v42 = vpop.permute.xlu0 %1485 }
 0x2bb   :  { %1122 = vmatprep.subr.bf16.mxu0 %v1986_v31  ;;  %v1490_v3 = vrot.slane %v1486_v42, 4 }
 0x2be   :  { %1123 = vmatpush1.bf16.msra.mxu0 %v1984_v61  ;;  %v1440_v4 = vpop.permute.xlu0 %1439  ;;  %v1488_v61 = vrot.slane %v1482_v55, 4 }
 0x2c1   :  { %1796 = vmatmul.mubr.msk.bf16.vlgmr.msra.gmra.mxu0 %vm372_vm8, %v1084_v62  ;;  %v1493_v62 = vsel %vm482_vm13, %v1489_v15, %v1490_v3 }
 0x2c2   :  { %v1444_v44 = vpop.permute.xlu0 %1443 }
 0x379   :  { %v2559_v48 = vpop.f32.mrf.mxu0 }
 0x37b   :  { %v2561_v0 = vpop.f32.mrf.mxu0 }
 0x37d   :  { %v2563_v63 = vpop.f32.mrf.mxu0 }
 0x37f   :  { %v2565_v28 = vpop.f32.mrf.mxu0 }
 0x381   :  { %v1142_v17 = vpop.f32.mrf.mxu0 }
 0x382   :  { %v1302_v2 = vmul.f32 %v1142_v17, %v2322_v29  ;;  %v1254_v38 = vmul.f32 %v1142_v17, %v2338_v37  ;;  %v1505_v52 = vmul.f32 %v1142_v17, %v2419_v32 }
 0x383   :  { %v1144_v30 = vpop.f32.mrf.mxu0 }
 0x384   :  { %v2567_v46 = vpack.c.bf16 %v1144_v30, %v1142_v17  ;;  %v1889_v8 = vpack.c.bf16 %v1144_v30, %v1144_v30  ;;  %v1896_v53 = vpack.c.bf16 %v1302_v2, %v2314_v26  ;;  %v1892_v29 = vpack.c.bf16 %v1254_v38, %v2331_v35 }
 0x385   :  { %v1146_v50 = vpop.f32.mrf.mxu0  ;;  %v1416_v39 = vmul.f32 %v1144_v30, %v2291_v10  ;;  %v1303_v41 = vmul.f32 %v1144_v30, %v2312_v25  ;;  %v1415_v26 = vmul.f32 %v1142_v17, %v2285_v5  ;;  %v1368_v6 = vmul.f32 %v1144_v30, %v2305_v20 }
 0x386   :  { %1479 = vrot.lane.b32.xlu1 %v2567_v46, %s2117_s3  ;;  %1229 = vrot.lane.b32.xlu0 %v1889_v8, %s2119_s8  ;;  %v1255_v7 = vmul.f32 %v1144_v30, %v2329_v34  ;;  %v1367_v10 = vmul.f32 %v1142_v17, %v2297_v13  ;;  %v1888_v5 = vpack.c.bf16 %v1142_v17, %v2108_v1 }
 0x387   :  { %v1147_v23 = vpop.f32.mrf.mxu0  ;;  %v1906_v37 = vpack.c.bf16 %v1416_v39, %v1415_v26  ;;  %v1897_v16 = vpack.c.bf16 %v1303_v41, %v1303_v41  ;;  %v1165_v43 = vmul.f32 %v1144_v30, %v2365_v49  ;;  %v1890_v20 = vpack.c.bf16 %v2424_v33, %v2108_v1  ;;  %v347_v1 = vld [vmem:[%s2702_s11 + $0x8] sm:$0xff] }
 0x388   :  { %v1902_v35 = vpack.c.bf16 %v1368_v6, %v1367_v10  ;;  %v1893_v25 = vpack.c.bf16 %v1255_v7, %v1255_v7  ;;  %v1164_v13 = vmul.f32 %v1142_v17, %v2406_v18  ;;  %v1167_v49 = vmul.f32 %v2424_v33, %v2406_v18 }
 0x389   :  { %v1885_v34 = vpack.c.bf16 %v1165_v43, %v1165_v43  ;;  %v1506_v54 = vmul.f32 %v1144_v30, %v2434_v40  ;;  %v1509_v18 = vmul.f32 %v2427_v36, %v2434_v40  ;;  %v1442_v36 = vpop.permute.xlu1 %1441  ;;  %v1392_v40 = vpop.permute.xlu0 %1391  ;;  %v1494_v8 = vsel %vm829_vm14, %v1484_v9, %v1493_v62 }
 0x38a   :  { %1323 = vrot.lane.b32.xlu1 %v1896_v53, %s2112_s9  ;;  %1233 = vrot.lane.b32.xlu0 %v1919_v19, %s2119_s8  ;;  %v1884_v47 = vpack.c.bf16 %v1164_v13, %v2415_v22  ;;  %v1886_v51 = vpack.c.bf16 %v1167_v49, %v2415_v22  ;;  %v346_v22 = vld [vmem:[%s2702_s11] sm:$0xff]  ;;  %s2121_s11 = smov [#allocation13]  }
 0x38b   :  { %v1914_v45 = vpack.c.bf16 %v1506_v54, %v1505_v52  ;;  %s1712_s13 = sshll.u32 %s2121_s11, 4  ;;  %s1713_s13 = int_to_ptr.vmem [resolvable:$true] %s1712_s13 }
 0x38c   :  { %s2074_s14 = scalar_lea.vmem %s1713_s13, 1024  ;;  %p2079_p7 = scmp.lt.s32.totalorder %s1713_s13, %s1713_s13 }
 0x38d   :  { %v1394_v56 = vpop.permute.xlu1 %1393  ;;  %v1396_v57 = vpop.permute.xlu0 %1395  ;;  %p2075_p6 = scmp.ne.s32.totalorder %s1713_s13, %s2074_s14  ;;  %p2080_p8 = scmp.lt.s32.totalorder %s2074_s14, %s2074_s14 }
 0x38e   :  { %1275 = vrot.lane.b32.xlu1 %v1892_v29, %s2111_s4  ;;  %1191 = vrot.lane.b32.xlu0 %v1887_v12, %s2116_s23  ;;  %v1448_v29 = vrot.slane %v1444_v44, 4  ;;  %v1447_v12 = vrot.slane %v1442_v36, 4  ;;  %v1400_v39 = vrot.slane %v1396_v57, 4  ;;  %v1399_v7 = vrot.slane %v1394_v56, 4 }
 0x38f   :  { %p2081_p9 = por %p2080_p8, %p2079_p7 }
 0x391   :  { %p2082_p10 = pnand %p2081_p9, %p2075_p6 }
 0x392   :  { %1437 = vrot.lane.b32.xlu1 %v1906_v37, %s2114_s22  ;;  %1325 = vrot.lane.b32.xlu0 %v1897_v16, %s2112_s9  ;;  %v1446_v37 = vrot.slane %v1440_v4, 4  ;;  %v1451_v16 = vsel %vm482_vm13, %v1447_v12, %v1448_v29 }
 0x396   :  { %1389 = vrot.lane.b32.xlu1 %v1902_v35, %s2113_s21  ;;  %1277 = vrot.lane.b32.xlu0 %v1893_v25, %s2111_s4  ;;  %v1398_v35 = vrot.slane %v1392_v40, 4  ;;  %v1403_v25 = vsel %vm482_vm13, %v1399_v7, %v1400_v39  ;;  %v1840_v40 = vcombine.high %v2567_v46, %v2413_v21 }
 0x39a   :  { %1227 = vrot.lane.b32.xlu1 %v1888_v5, %s2119_s8  ;;  %1529 = vrot.lane.b32.xlu0 %v2396_v14, %s2115_s1  ;;  %v1452_v5 = vsel %vm554_vm9, %v1442_v36, %v1451_v16 }
 0x39e   :  { %1231 = vrot.lane.b32.xlu1 %v1890_v20, %s2119_s8  ;;  %1187 = vrot.lane.b32.xlu0 %v1885_v34, %s2116_s23 }
 0x3a2   :  { %1185 = vrot.lane.b32.xlu1 %v1884_v47, %s2116_s23  ;;  %1533 = vrot.lane.b32.xlu0 %v2396_v14, %s2115_s1  ;;  %v1508_v14 = vmul.f32 %v2424_v33, %v2419_v32  ;;  %v2626_v32 = vpop.permute.xlu1 %1327  ;;  %v1330_v33 = vpop.permute.xlu0 %1329 }
 0x3a4   :  { %v1916_v11 = vpack.c.bf16 %v1509_v18, %v1508_v14  ;;  %v1333_v18 = vrot.slane %v2626_v32, 4 }
 0x3a6   :  { %1189 = vrot.lane.b32.xlu1 %v1886_v51, %s2116_s23  ;;  %920 = vperm.xlu0 %1969, %v347_v1   ;;  %v2628_v58 = vpop.permute.xlu1 %1279  ;;  %v2630_v24 = vpop.permute.xlu0 %1281  ;;  %v1334_v51 = vrot.slane %v1330_v33, 4 }
 0x3a7   :  { %v1286_v44 = vrot.slane %v2630_v24, 4  ;;  %v1285_v15 = vrot.slane %v2628_v58, 4 }
 0x3a8   :  { %v1337_v9 = vsel %vm482_vm13, %v1333_v18, %v1334_v51 }
 0x3a9   :  { %v1338_v24 = vsel %vm652_vm6, %v2626_v32, %v1337_v9  ;;  %v1289_v62 = vsel %vm482_vm13, %v1285_v15, %v1286_v44 }
 0x3aa   :  { %1527 = vrot.lane.b32.xlu1 %v1914_v45, %s2115_s1  ;;  %v1404_v45 = vsel %vm612_vm7, %v1394_v56, %v1403_v25 }
 0x3ae   :  { %1531 = vrot.lane.b32.xlu1 %v1916_v11, %s2115_s1 }
 0x3b2   :  { %915 = vperm.xlu1 %1970, %v346_v22  }
 0x3f8   :  { %v1480_v60 = vpop.permute.xlu1 %1479  ;;  %v2632_v31 = vpop.permute.xlu0 %1229 }
 0x3f9   :  { %v1487_v17 = vrot.slane %v1480_v60, 4 }
 0x3fb   :  { %v1491_v30 = vsel %vm482_vm13, %v1487_v17, %v1488_v61  ;;  %v1839_v61 = vcombine.low %v2567_v46, %v2413_v21  ;;  %v1290_v46 = vsel %vm594_vm5, %v2628_v58, %v1289_v62 }
 0x3fc   :  { %v1492_v2 = vsel %vm829_vm14, %v1480_v60, %v1491_v30  ;;  %v1324_v50 = vpop.permute.xlu1 %1323  ;;  %v2638_v19 = vpop.permute.xlu0 %1233 }
 0x3fd   :  { %v1845_v23 = vcombine.low %v1492_v2, %v1494_v8  ;;  %v1846_v53 = vcombine.high %v1492_v2, %v1494_v8  ;;  %v1331_v54 = vrot.slane %v1324_v50, 4  ;;  %v1238_v17 = vrot.slane %v2638_v19, 4 }
 0x3ff   :  { %1655 = vmatprep.subr.bf16.mxu1 %v1846_v53 }
 0x400   :  { %1656 = vmatpush1.bf16.msra.mxu1 %v1845_v23  ;;  %v1276_v38 = vpop.permute.xlu1 %1275  ;;  %v2640_v27 = vpop.permute.xlu0 %1191  ;;  %v1236_v23 = vrot.slane %v2632_v31, 4 }
 0x401   :  { %v1283_v36 = vrot.slane %v1276_v38, 4 }
 0x404   :  { %v1438_v41 = vpop.permute.xlu1 %1437  ;;  %v1326_v26 = vpop.permute.xlu0 %1325 }
 0x405   :  { %v1445_v6 = vrot.slane %v1438_v41, 4  ;;  %v1332_v47 = vrot.slane %v1326_v26, 4 }
 0x407   :  { %v1449_v10 = vsel %vm482_vm13, %v1445_v6, %v1446_v37  ;;  %v1335_v22 = vsel %vm482_vm13, %v1331_v54, %v1332_v47 }
 0x408   :  { %v1450_v43 = vsel %vm554_vm9, %v1438_v41, %v1449_v10  ;;  %v1390_v20 = vpop.permute.xlu1 %1389  ;;  %v1278_v1 = vpop.permute.xlu0 %1277  ;;  %v1336_v33 = vsel %vm652_vm6, %v1324_v50, %v1335_v22 }
 0x409   :  { %v1843_v34 = vcombine.low %v1450_v43, %v1452_v5  ;;  %v1844_v13 = vcombine.high %v1450_v43, %v1452_v5  ;;  %v1397_v49 = vrot.slane %v1390_v20, 4  ;;  %v1284_v4 = vrot.slane %v1278_v1, 4 }
 0x40a   :  { %v1838_v8 = vcombine.high %v1336_v33, %v1338_v24  ;;  %v1837_v21 = vcombine.low %v1336_v33, %v1338_v24 }
 0x40b   :  { %v1401_v52 = vsel %vm482_vm13, %v1397_v49, %v1398_v35  ;;  %1657 = vmatprep.subr.bf16.mxu1 %v1844_v13  ;;  %v1287_v3 = vsel %vm482_vm13, %v1283_v36, %v1284_v4 }
 0x40c   :  { %v1402_v14 = vsel %vm612_vm7, %v1390_v20, %v1401_v52  ;;  %1658 = vmatpush1.bf16.msra.mxu1 %v1843_v34  ;;  %v1228_v11 = vpop.permute.xlu1 %1227  ;;  %v1530_v57 = vpop.permute.xlu0 %1529  ;;  %v1288_v50 = vsel %vm594_vm5, %v1276_v38, %v1287_v3  ;;  %v1196_v38 = vrot.slane %v2640_v27, 4 }
 0x40d   :  { %v1841_v55 = vcombine.low %v1402_v14, %v1404_v45  ;;  %v1842_v42 = vcombine.high %v1402_v14, %v1404_v45  ;;  %v1235_v30 = vrot.slane %v1228_v11, 4  ;;  %v1836_v19 = vcombine.high %v1288_v50, %v1290_v46 }
 0x40e   :  { %v1835_v16 = vcombine.low %v1288_v50, %v1290_v46  ;;  %v1536_v20 = vrot.slane %v1530_v57, 4 }
 0x40f   :  { %1659 = vmatprep.subr.bf16.mxu1 %v1842_v42  ;;  %v1239_v32 = vsel %vm482_vm13, %v1235_v30, %v1236_v23 }
 0x410   :  { %1660 = vmatpush1.bf16.msra.mxu1 %v1841_v55  ;;  %v1232_v56 = vpop.permute.xlu1 %1231  ;;  %v1188_v29 = vpop.permute.xlu0 %1187  ;;  %v1240_v37 = vsel %vm527_vm12, %v1228_v11, %v1239_v32 }
 0x411   :  { %v1237_v60 = vrot.slane %v1232_v56, 4  ;;  %1661 = vmatprep.subr.bf16.mxu1 %v1840_v40  ;;  %v1194_v26 = vrot.slane %v1188_v29, 4 }
 0x413   :  { %v1241_v53 = vsel %vm482_vm13, %v1237_v60, %v1238_v17 }
 0x414   :  { %v1186_v2 = vpop.permute.xlu1 %1185  ;;  %1662 = vmatpush1.bf16.msra.mxu1 %v1839_v61  ;;  %v1242_v39 = vsel %vm527_vm12, %v1232_v56, %v1241_v53  ;;  %v1534_v25 = vpop.permute.xlu0 %1533 }
 0x415   :  { %1663 = vmatprep.subr.bf16.mxu1 %v1838_v8  ;;  %v1193_v12 = vrot.slane %v1186_v2, 4  ;;  %v1834_v6 = vcombine.high %v1240_v37, %v1242_v39  ;;  %v1833_v43 = vcombine.low %v1240_v37, %v1242_v39  ;;  %v1538_v47 = vrot.slane %v1534_v25, 4 }
 0x417   :  { %v1197_v7 = vsel %vm482_vm13, %v1193_v12, %v1194_v26 }
 0x418   :  { %v1190_v41 = vpop.permute.xlu1 %1189  ;;  %1664 = vmatpush1.bf16.msra.mxu1 %v1837_v21  ;;  %v1198_v27 = vsel %vm484_vm11, %v1186_v2, %v1197_v7 }
 0x419   :  { %v1195_v31 = vrot.slane %v1190_v41, 4  ;;  %1665 = vmatprep.subr.bf16.mxu1 %v1836_v19 }
 0x41b   :  { %v1199_v58 = vsel %vm482_vm13, %v1195_v31, %v1196_v38 }
 0x41c   :  { %v1200_v10 = vsel %vm484_vm11, %v1190_v41, %v1199_v58  ;;  %v1528_v35 = vpop.permute.xlu1 %1527  ;;  %1666 = vmatpush1.bf16.msra.mxu1 %v1835_v16 }
 0x41d   :  { %v1535_v5 = vrot.slane %v1528_v35, 4  ;;  %1667 = vmatprep.subr.bf16.mxu1 %v1834_v6  ;;  %v1832_v34 = vcombine.high %v1198_v27, %v1200_v10  ;;  %v1831_v54 = vcombine.low %v1198_v27, %v1200_v10 }
 0x41f   :  { %v1539_v49 = vsel %vm482_vm13, %v1535_v5, %v1536_v20 }
 0x420   :  { %v1532_v13 = vpop.permute.xlu1 %1531  ;;  %1668 = vmatpush1.bf16.msra.mxu1 %v1833_v43  ;;  %v1540_v14 = vsel %vm443_vm10, %v1528_v35, %v1539_v49 }
 0x421   :  { %v1537_v1 = vrot.slane %v1532_v13, 4  ;;  %1669 = vmatprep.subr.bf16.mxu1 %v1832_v34  ;;  %v921_v51 = vpop.permute.xlu0 %920 }
 0x422   :  { %v1065_v52 = vadd.f32 %v2563_v63, %v921_v51  ;;  %v1067_v18 = vadd.f32 %v2565_v28, %v921_v51 }
 0x423   :  { %v1541_v45 = vsel %vm482_vm13, %v1537_v1, %v1538_v47 }
 0x424   :  { %v1542_v11 = vsel %vm443_vm10, %v1532_v13, %v1541_v45  ;;  %v1071_v22 = vmax.f32 %v1065_v52, 0.0  ;;  %v1072_v55 = vmax.f32 %v1067_v18, 0.0  ;;  %1670 = vmatpush1.bf16.msra.mxu1 %v1831_v54 }
 0x425   :  { %v1847_v42 = vcombine.low %v1540_v14, %v1542_v11  ;;  %v1848_v4 = vcombine.high %v1540_v14, %v1542_v11 }
 0x426   :  { %1075 = vst [vmem:[#allocation13 + $0x10] sm:$0xff] %v1071_v22  ;;  %1076 = vst [vmem:[#allocation13 + $0x18] sm:$0xff] %v1072_v55 }
 0x427   :  { %1685 = vmatprep.subr.bf16.mxu1 %v1848_v4 }
 0x428   :  { %1686 = vmatpush2.bf16.msra.mxu1 %v1847_v42 }
 0x42b   :  { %1688 = vmatmul.mubr.bf16.vlgmr.msra.gmra.mxu1 %v2554_v59 }
 0x42d   :  { %v916_v63 = vpop.permute.xlu1 %915 }
 0x42e   :  { %v1061_v28 = vadd.f32 %v2559_v48, %v916_v63  ;;  %v1063_v9 = vadd.f32 %v2561_v0, %v916_v63 }
 0x430   :  { %v1069_v44 = vmax.f32 %v1061_v28, 0.0  ;;  %v1070_v36 = vmax.f32 %v1063_v9, 0.0 }
 0x432   :  { %1073 = vst [vmem:[#allocation13] sm:$0xff] %v1069_v44  ;;  %1074 = vst [vmem:[#allocation13 + $0x8] sm:$0xff] %v1070_v36 }
 0x4eb   :  { %v1689_v40 = vpop.f32.mrf.mxu1 }
 0x4ec   :  { %v1690_v57 = vadd.f32 %v1689_v40, %v916_v63 }
 0x4ed   :  { %v1691_v56 = vpop.f32.mrf.mxu1 }
 0x4ee   :  { %v1698_v33 = vmax.f32 %v1690_v57, 0.0  ;;  %v1692_v15 = vadd.f32 %v1691_v56, %v916_v63 }
 0x4ef   :  { %v1693_v3 = vpop.f32.mrf.mxu1 }
 0x4f0   :  { %1703 = vst [vmem:[#allocation13 + $0x20] sm:$0xff] %v1698_v33  ;;  %v1699_v60 = vmax.f32 %v1692_v15, 0.0  ;;  %v1694_v61 = vadd.f32 %v1693_v3, %v921_v51 }
 0x4f1   :  { %v1695_v24 = vpop.f32.mrf.mxu1 }
 0x4f2   :  { %1704 = vst [vmem:[#allocation13 + $0x28] sm:$0xff] %v1699_v60  ;;  %v1700_v59 = vmax.f32 %v1694_v61, 0.0  ;;  %v1696_v48 = vadd.f32 %v1695_v24, %v921_v51 }
 0x4f4   :  { %1705 = vst [vmem:[#allocation13 + $0x30] sm:$0xff] %v1700_v59  ;;  %v1701_v0 = vmax.f32 %v1696_v48, 0.0 }
 0x4f6   :  { %1706 = vst [vmem:[#allocation13 + $0x38] sm:$0xff] %v1701_v0 }
 0x4f7   :  { %2085 = shalt.err (!%p2082_p10)
}
 0x4f8   :  { %s2122_s15 = smov 256  }
 0x4f9   :  { %1718 = dma.vmem_to_hbm [thread:$0]  %s1713_s13, 1024, %s2703_s12, [#allocation7], %s2122_s15, %s2122_s15, %s2119_s8  }
 0x4fa   :  { %2100 = dma.done.wait [#allocation7], 1024  }
 0x4fb   :  { %2101 = vsyncadd [#allocation7], 4294966272 }
 0x4fc   :  { %1722 = vsyncpa [#allocation6], 1 }
 0x4fd   :  { %1723 = vsyncpa [#allocation9], 1 }
 0x4fe   :  { %1724 = vsyncpa [#allocation12], 1 }
 0x4ff   :  { %1725 = vsyncpa [#allocation7], 1 }

</bundles_post_ra>
